<compile_context>
chip_gen: v5e
topology: v5e:2x2
jax: 0.10.0
libtpu: 0.0.40
codegen_flags: <defaults>
</compile_context>

<pallas_src>
import jax
import jax.numpy as jnp
from jax import lax
from jax.experimental import pallas as pl
from jax.experimental.pallas import tpu as pltpu


def _round_up(x, m):
    return (x + m - 1) // m * m


def _cdiv(a, b):
    return -(-a // b)


def _next_pow2(x):
    return 1 if x <= 1 else 1 << (x - 1).bit_length()


def _build_tap_plan(kernel_sizes, maxp):
    """Group all taps by their unique (dy, dx) offset in the max-padded frame.

    Returns (plan, total_taps) where plan is a static nested tuple
      ((dy, ((dx, ((branch_idx, tap_row), ...)), ...)), ...)
    so the kernel loads/aligns each unique window exactly once and FMAs it into
    every branch accumulator that uses it.
    """
    per_offset = {}
    row = 0
    for bi, k in enumerate(kernel_sizes):
        base = maxp - k // 2
        for ty in range(k):
            for tx in range(k):
                per_offset.setdefault((base + ty, base + tx), []).append((bi, row))
                row += 1
    plan = []
    for dy in sorted({dy for dy, _ in per_offset}):
        dxs = sorted({dx for (d, dx) in per_offset if d == dy})
        plan.append((dy, tuple((dx, tuple(per_offset[(dy, dx)])) for dx in dxs)))
    return tuple(plan), row


def _make_mainpart_kernel(plan, cp, n_branches):
    """Fused per-strip kernel (all shapes / tap structure static, fully unrolled)."""

    def kernel(x_ref, w_ref, shift_ref, out_ref):
        # x_ref     : (1, Hs_in, Lane_in)   Lane_in = (Wo + 2*maxp) * Cp, lane = w*Cp + c
        # w_ref     : (T, Lane_out)         BN-folded tap weights, tiled across w positions
        # shift_ref : (B, Lane_out)         BN-folded per-branch shifts (f32), tiled
        # out_ref   : (1, Hs, Lane_out)     Lane_out = Wo * Cp
        hs, lo = out_ref.shape[1], out_ref.shape[2]
        accs = [None] * n_branches
        for dy, dx_group in plan:
            # One sublane-shifted row window per dy residue, shared by all dx / branches.
            xrows = x_ref[0, dy:dy + hs, :]
            for dx, users in dx_group:
                # One lane-shifted window per unique (dy, dx); lane-aligned when Cp % 128 == 0.
                xs = xrows[:, dx * cp: dx * cp + lo]
                for bi, t in users:
                    contrib = xs * w_ref[t:t + 1, :]          # (Hs, Lo) * (1, Lo) broadcast
                    if accs[bi] is None:
                        # Fold the BN shift into the accumulator init (no zeros + extra add).
                        accs[bi] = shift_ref[bi:bi + 1, :] + contrib   # f32 accumulate
                    else:
                        accs[bi] = accs[bi] + contrib
        result = None
        for bi in range(n_branches):
            y = jnp.clip(accs[bi].astype(jnp.float32), 0.0, 6.0)      # ReLU6
            result = y if result is None else result * y               # branch product
        out_ref[0] = result.astype(out_ref.dtype)

    return kernel


def mainpart_forward(x_nchw, params, kernel_sizes=(1, 3, 5), stride=1,
                     compute_dtype=jnp.float32):
    """MainPart forward. x_nchw: (N, C, H, W) -> (N, C, H_out, W_out)."""
    assert all(k % 2 == 1 for k in kernel_sizes), "odd kernel sizes expected"
    kernel_sizes = tuple(kernel_sizes)
    N, C, H, W = x_nchw.shape
    n_branches = len(kernel_sizes)
    maxp = max(k // 2 for k in kernel_sizes)
    itemsize = jnp.dtype(compute_dtype).itemsize

    # ---- lane packing: lane = (w position) * Cp + c;  no padding of C to 128 ----
    Cp = _next_pow2(C) if C <= 128 else _round_up(C, 128)   # divisor or multiple of 128
    Wq = max(1, 128 // Cp)                                   # w positions per 128 lanes
    Wo = _round_up(W, Wq)                                    # packed output width
    Wi = Wo + 2 * maxp                                       # packed input width (with halo)
    lane_out = Wo * Cp                                       # multiple of 128
    lane_in = Wi * Cp

    # ---- H-strip tiling keyed on actual VMEM capacity (v7x needs small strips) ----
    try:
        vmem_cap = int(pltpu.get_tpu_info().vmem_capacity_bytes)
    except Exception:
        vmem_cap = 64 * 1024 * 1024
    budget = vmem_cap // 4
    per_row = (2 * lane_in * itemsize            # double-buffered input rows
               + 2 * lane_out * 4                # double-buffered f32 output rows
               + (n_branches + 3) * lane_out * 4)  # live accumulators / window temps
    hs_cap = max(8, (budget // max(per_row, 1)) // 8 * 8)
    # aim for >= 2 row strips so grid length > N (megacore split / pipeline overlap)
    hs = max(8, min(hs_cap, _round_up(max(_cdiv(H, 2), 1), 8), _round_up(H, 8)))
    S = _cdiv(H, hs)
    hs_in = hs + 2 * maxp
    h_tot = S * hs + 2 * maxp

    plan, T = _build_tap_plan(kernel_sizes, maxp)

    # ---- wrapper layout prep (cheap now: no channel inflation) ----
    x = jnp.transpose(x_nchw, (0, 2, 3, 1)).astype(compute_dtype)          # NHWC
    x = jnp.pad(x, ((0, 0),
                    (maxp, S * hs - H + maxp),
                    (maxp, Wi - W - maxp),
                    (0, Cp - C)))
    x = x.reshape(N, h_tot, lane_in)                                        # pack (w, c) lanes
    # overlapping H strips (halo rows duplicated once; tiny vs. the old Cp=128 blowup)
    row_idx = jnp.arange(S)[:, None] * hs + jnp.arange(hs_in)[None, :]      # (S, hs_in)
    x_strips = x[:, row_idx, :].reshape(N * S, hs_in, lane_in)

    # ---- fold eval-mode BatchNorm into taps + per-branch shift; tile across w ----
    taps, shifts = [], []
    for k in kernel_sizes:
        p = params[f"conv{k}"]
        scale = p["gamma"] / jnp.sqrt(p["var"] + 1e-5)                      # (C,)
        shift = p["beta"] - p["mean"] * scale                               # (C,)
        w = p["w"][:, 0, :, :].astype(jnp.float32) * scale[:, None, None]   # (C,k,k)
        taps.append(jnp.transpose(w, (1, 2, 0)).reshape(k * k, C))          # (k*k, C)
        shifts.append(shift)
    w_all = jnp.pad(jnp.concatenate(taps, axis=0), ((0, 0), (0, Cp - C)))   # (T, Cp)
    w_all = jnp.tile(w_all, (1, Wo)).astype(compute_dtype)                  # (T, lane_out)
    shift_all = jnp.pad(jnp.stack(shifts, 0), ((0, 0), (0, Cp - C)))        # (B, Cp)
    shift_all = jnp.tile(shift_all, (1, Wo)).astype(jnp.float32)            # (B, lane_out)

    # ---- VMEM limit computed from block bytes (headroom; <= 48 MiB per review) ----
    need = (2 * hs_in * lane_in * itemsize
            + 2 * hs * lane_out * 4
            + T * lane_out * itemsize + n_branches * lane_out * 4
            + (n_branches + 3) * hs * lane_out * 4)
    vmem_limit = int(min(48 * 1024 * 1024, max(4 * 1024 * 1024, 2 * need)))

    out = pl.pallas_call(
        _make_mainpart_kernel(plan, Cp, n_branches),
        out_shape=jax.ShapeDtypeStruct((N * S, hs, lane_out), jnp.float32),
        grid_spec=pltpu.PrefetchScalarGridSpec(
            num_scalar_prefetch=0,
            grid=(N * S,),
            in_specs=[
                pl.BlockSpec((1, hs_in, lane_in), lambda g: (g, 0, 0)),
                pl.BlockSpec((T, lane_out), lambda g: (0, 0)),            # resident
                pl.BlockSpec((n_branches, lane_out), lambda g: (0, 0)),   # resident
            ],
            out_specs=pl.BlockSpec((1, hs, lane_out), lambda g: (g, 0, 0)),
        ),
        compiler_params=pltpu.CompilerParams(
            dimension_semantics=("parallel",),
            vmem_limit_bytes=vmem_limit,
        ),
    )(x_strips, w_all, shift_all)

    # strip pad rows / pad width / pad channels, back to NCHW
    out = out.reshape(N, S * hs, Wo, Cp)[:, :H, :W, :C]
    if stride > 1:
        out = out[:, ::stride, ::stride, :]
    return jnp.transpose(out, (0, 3, 1, 2)).astype(jnp.float32)


# ---------------------------- reference (pure JAX) ---------------------------
def mainpart_reference(x_nchw, params, kernel_sizes=(1, 3, 5), stride=1):
    N, C, H, W = x_nchw.shape
    x = jnp.transpose(x_nchw, (0, 2, 3, 1)).astype(jnp.float32)
    result = None
    for k in kernel_sizes:
        p = params[f"conv{k}"]
        w_hwio = jnp.transpose(p["w"], (2, 3, 1, 0)).astype(jnp.float32)  # (k,k,1,C)
        pad = k // 2
        y = lax.conv_general_dilated(
            x, w_hwio, window_strides=(stride, stride),
            padding=[(pad, pad), (pad, pad)],
            dimension_numbers=("NHWC", "HWIO", "NHWC"),
            feature_group_count=C)
        scale = p["gamma"] / jnp.sqrt(p["var"] + 1e-5)
        y = (y - p["mean"]) * scale + p["beta"]
        y = jnp.clip(y, 0.0, 6.0)                                          # ReLU6
        result = y if result is None else result * y
    return jnp.transpose(result, (0, 3, 1, 2))


# ---------------------------- parameter init ---------------------------------
def make_params(key, c, kernel_sizes=(1, 3, 5)):
    params = {}
    for k in kernel_sizes:
        key, k1, k2, k3, k4, k5 = jax.random.split(key, 6)
        params[f"conv{k}"] = dict(
            w=(1.0 / k) * jax.random.normal(k1, (c, 1, k, k), jnp.float32),
            gamma=1.0 + 0.1 * jax.random.normal(k2, (c,), jnp.float32),
            beta=0.2 + 0.1 * jax.random.normal(k3, (c,), jnp.float32),
            mean=0.1 * jax.random.normal(k4, (c,), jnp.float32),
            var=1.0 + 0.1 * jnp.abs(jax.random.normal(k5, (c,), jnp.float32)),
        )
    return params


if __name__ == "__main__":
    N, C, H, W = 2, 4, 16, 16
    kernel_sizes = (1, 3, 5)
    key = jax.random.PRNGKey(0)
    kx, kp = jax.random.split(key)
    x = jax.random.normal(kx, (N, C, H, W), jnp.float32)
    params = make_params(kp, C, kernel_sizes)

    # f32 path (default; exact vs reference)
    out = jax.block_until_ready(mainpart_forward(x, params, kernel_sizes))
    ref = jax.block_until_ready(mainpart_reference(x, params, kernel_sizes))
    assert out.shape == (N, C, H, W), out.shape
    max_err = float(jnp.max(jnp.abs(out - ref)))
    assert jnp.allclose(out, ref, atol=1e-4, rtol=1e-4), max_err

    # bf16 tap-math path (v6e/v7x VPU); f32 accumulation inside, loose sanity check.
    out_bf16 = jax.block_until_ready(
        mainpart_forward(x, params, kernel_sizes, compute_dtype=jnp.bfloat16))
    assert out_bf16.shape == (N, C, H, W), out_bf16.shape
    assert bool(jnp.all(jnp.isfinite(out_bf16)))

    print("KERNEL_OK")
</pallas_src>

<mosaic_0001>
module attributes {stable_mosaic.version = 11 : i64} {
  func.func @kernel(%arg0: i32, %arg1: memref<1x12x144xf32, #tpu.memory_space<vmem>>, %arg2: memref<35x128xf32, #tpu.memory_space<vmem>>, %arg3: memref<3x128xf32, #tpu.memory_space<vmem>>, %arg4: memref<1x8x128xf32, #tpu.memory_space<vmem>>) attributes {dimension_semantics = [#tpu.dimension_semantics<parallel>], iteration_bounds = array<i64: 4>, scalar_prefetch = 0 : i64, scratch_operands = 0 : i64, tpu.core_type = #tpu.core_type<tc>, window_params = [{transform_indices = @transform_0, window_bounds = array<i64: 1, 12, 144>}, {pipeline_mode = #tpu.pipeline_mode<synchronous>, transform_indices = @transform_1, window_bounds = array<i64: 35, 128>}, {pipeline_mode = #tpu.pipeline_mode<synchronous>, transform_indices = @transform_2, window_bounds = array<i64: 3, 128>}, {transform_indices = @transform_3, window_bounds = array<i64: 1, 8, 128>}]} {
    %c0 = arith.constant 0 : index
    %c0_0 = arith.constant 0 : index
    %c0_1 = arith.constant 0 : index
    %0 = vector.load %arg1[%c0, %c0_0, %c0_1] : memref<1x12x144xf32, #tpu.memory_space<vmem>>, vector<1x8x144xf32>
    %1 = vector.shape_cast %0 : vector<1x8x144xf32> to vector<8x144xf32>
    %2 = vector.extract_strided_slice %1 {offsets = [0, 0], sizes = [8, 128], strides = [1, 1]} : vector<8x144xf32> to vector<8x128xf32>
    %c10 = arith.constant 10 : index
    %c0_2 = arith.constant 0 : index
    %3 = vector.load %arg2[%c10, %c0_2] : memref<35x128xf32, #tpu.memory_space<vmem>>, vector<1x128xf32>
    %4 = vector.broadcast %3 : vector<1x128xf32> to vector<8x128xf32>
    %5 = arith.mulf %2, %4 : vector<8x128xf32>
    %c2 = arith.constant 2 : index
    %c0_3 = arith.constant 0 : index
    %6 = vector.load %arg3[%c2, %c0_3] : memref<3x128xf32, #tpu.memory_space<vmem>>, vector<1x128xf32>
    %7 = vector.broadcast %6 : vector<1x128xf32> to vector<8x128xf32>
    %8 = arith.addf %7, %5 : vector<8x128xf32>
    %9 = vector.extract_strided_slice %1 {offsets = [0, 4], sizes = [8, 128], strides = [1, 1]} : vector<8x144xf32> to vector<8x128xf32>
    %c11 = arith.constant 11 : index
    %c0_4 = arith.constant 0 : index
    %10 = vector.load %arg2[%c11, %c0_4] : memref<35x128xf32, #tpu.memory_space<vmem>>, vector<1x128xf32>
    %11 = vector.broadcast %10 : vector<1x128xf32> to vector<8x128xf32>
    %12 = arith.mulf %9, %11 : vector<8x128xf32>
    %13 = arith.addf %8, %12 : vector<8x128xf32>
    %14 = vector.extract_strided_slice %1 {offsets = [0, 8], sizes = [8, 128], strides = [1, 1]} : vector<8x144xf32> to vector<8x128xf32>
    %c12 = arith.constant 12 : index
    %c0_5 = arith.constant 0 : index
    %15 = vector.load %arg2[%c12, %c0_5] : memref<35x128xf32, #tpu.memory_space<vmem>>, vector<1x128xf32>
    %16 = vector.broadcast %15 : vector<1x128xf32> to vector<8x128xf32>
    %17 = arith.mulf %14, %16 : vector<8x128xf32>
    %18 = arith.addf %13, %17 : vector<8x128xf32>
    %19 = vector.extract_strided_slice %1 {offsets = [0, 12], sizes = [8, 128], strides = [1, 1]} : vector<8x144xf32> to vector<8x128xf32>
    %c13 = arith.constant 13 : index
    %c0_6 = arith.constant 0 : index
    %20 = vector.load %arg2[%c13, %c0_6] : memref<35x128xf32, #tpu.memory_space<vmem>>, vector<1x128xf32>
    %21 = vector.broadcast %20 : vector<1x128xf32> to vector<8x128xf32>
    %22 = arith.mulf %19, %21 : vector<8x128xf32>
    %23 = arith.addf %18, %22 : vector<8x128xf32>
    %24 = vector.extract_strided_slice %1 {offsets = [0, 16], sizes = [8, 128], strides = [1, 1]} : vector<8x144xf32> to vector<8x128xf32>
    %c14 = arith.constant 14 : index
    %c0_7 = arith.constant 0 : index
    %25 = vector.load %arg2[%c14, %c0_7] : memref<35x128xf32, #tpu.memory_space<vmem>>, vector<1x128xf32>
    %26 = vector.broadcast %25 : vector<1x128xf32> to vector<8x128xf32>
    %27 = arith.mulf %24, %26 : vector<8x128xf32>
    %28 = arith.addf %23, %27 : vector<8x128xf32>
    %c0_8 = arith.constant 0 : index
    %c1 = arith.constant 1 : index
    %c0_9 = arith.constant 0 : index
    %29 = vector.load %arg1[%c0_8, %c1, %c0_9] : memref<1x12x144xf32, #tpu.memory_space<vmem>>, vector<1x8x144xf32>
    %30 = vector.shape_cast %29 : vector<1x8x144xf32> to vector<8x144xf32>
    %31 = vector.extract_strided_slice %30 {offsets = [0, 0], sizes = [8, 128], strides = [1, 1]} : vector<8x144xf32> to vector<8x128xf32>
    %c15 = arith.constant 15 : index
    %c0_10 = arith.constant 0 : index
    %32 = vector.load %arg2[%c15, %c0_10] : memref<35x128xf32, #tpu.memory_space<vmem>>, vector<1x128xf32>
    %33 = vector.broadcast %32 : vector<1x128xf32> to vector<8x128xf32>
    %34 = arith.mulf %31, %33 : vector<8x128xf32>
    %35 = arith.addf %28, %34 : vector<8x128xf32>
    %36 = vector.extract_strided_slice %30 {offsets = [0, 4], sizes = [8, 128], strides = [1, 1]} : vector<8x144xf32> to vector<8x128xf32>
    %c1_11 = arith.constant 1 : index
    %c0_12 = arith.constant 0 : index
    %37 = vector.load %arg2[%c1_11, %c0_12] : memref<35x128xf32, #tpu.memory_space<vmem>>, vector<1x128xf32>
    %38 = vector.broadcast %37 : vector<1x128xf32> to vector<8x128xf32>
    %39 = arith.mulf %36, %38 : vector<8x128xf32>
    %c1_13 = arith.constant 1 : index
    %c0_14 = arith.constant 0 : index
    %40 = vector.load %arg3[%c1_13, %c0_14] : memref<3x128xf32, #tpu.memory_space<vmem>>, vector<1x128xf32>
    %41 = vector.broadcast %40 : vector<1x128xf32> to vector<8x128xf32>
    %42 = arith.addf %41, %39 : vector<8x128xf32>
    %c16 = arith.constant 16 : index
    %c0_15 = arith.constant 0 : index
    %43 = vector.load %arg2[%c16, %c0_15] : memref<35x128xf32, #tpu.memory_space<vmem>>, vector<1x128xf32>
    %44 = vector.broadcast %43 : vector<1x128xf32> to vector<8x128xf32>
    %45 = arith.mulf %36, %44 : vector<8x128xf32>
    %46 = arith.addf %35, %45 : vector<8x128xf32>
    %47 = vector.extract_strided_slice %30 {offsets = [0, 8], sizes = [8, 128], strides = [1, 1]} : vector<8x144xf32> to vector<8x128xf32>
    %c2_16 = arith.constant 2 : index
    %c0_17 = arith.constant 0 : index
    %48 = vector.load %arg2[%c2_16, %c0_17] : memref<35x128xf32, #tpu.memory_space<vmem>>, vector<1x128xf32>
    %49 = vector.broadcast %48 : vector<1x128xf32> to vector<8x128xf32>
    %50 = arith.mulf %47, %49 : vector<8x128xf32>
    %51 = arith.addf %42, %50 : vector<8x128xf32>
    %c17 = arith.constant 17 : index
    %c0_18 = arith.constant 0 : index
    %52 = vector.load %arg2[%c17, %c0_18] : memref<35x128xf32, #tpu.memory_space<vmem>>, vector<1x128xf32>
    %53 = vector.broadcast %52 : vector<1x128xf32> to vector<8x128xf32>
    %54 = arith.mulf %47, %53 : vector<8x128xf32>
    %55 = arith.addf %46, %54 : vector<8x128xf32>
    %56 = vector.extract_strided_slice %30 {offsets = [0, 12], sizes = [8, 128], strides = [1, 1]} : vector<8x144xf32> to vector<8x128xf32>
    %c3 = arith.constant 3 : index
    %c0_19 = arith.constant 0 : index
    %57 = vector.load %arg2[%c3, %c0_19] : memref<35x128xf32, #tpu.memory_space<vmem>>, vector<1x128xf32>
    %58 = vector.broadcast %57 : vector<1x128xf32> to vector<8x128xf32>
    %59 = arith.mulf %56, %58 : vector<8x128xf32>
    %60 = arith.addf %51, %59 : vector<8x128xf32>
    %c18 = arith.constant 18 : index
    %c0_20 = arith.constant 0 : index
    %61 = vector.load %arg2[%c18, %c0_20] : memref<35x128xf32, #tpu.memory_space<vmem>>, vector<1x128xf32>
    %62 = vector.broadcast %61 : vector<1x128xf32> to vector<8x128xf32>
    %63 = arith.mulf %56, %62 : vector<8x128xf32>
    %64 = arith.addf %55, %63 : vector<8x128xf32>
    %65 = vector.extract_strided_slice %30 {offsets = [0, 16], sizes = [8, 128], strides = [1, 1]} : vector<8x144xf32> to vector<8x128xf32>
    %c19 = arith.constant 19 : index
    %c0_21 = arith.constant 0 : index
    %66 = vector.load %arg2[%c19, %c0_21] : memref<35x128xf32, #tpu.memory_space<vmem>>, vector<1x128xf32>
    %67 = vector.broadcast %66 : vector<1x128xf32> to vector<8x128xf32>
    %68 = arith.mulf %65, %67 : vector<8x128xf32>
    %69 = arith.addf %64, %68 : vector<8x128xf32>
    %c0_22 = arith.constant 0 : index
    %c2_23 = arith.constant 2 : index
    %c0_24 = arith.constant 0 : index
    %70 = vector.load %arg1[%c0_22, %c2_23, %c0_24] : memref<1x12x144xf32, #tpu.memory_space<vmem>>, vector<1x8x144xf32>
    %71 = vector.shape_cast %70 : vector<1x8x144xf32> to vector<8x144xf32>
    %72 = vector.extract_strided_slice %71 {offsets = [0, 0], sizes = [8, 128], strides = [1, 1]} : vector<8x144xf32> to vector<8x128xf32>
    %c20 = arith.constant 20 : index
    %c0_25 = arith.constant 0 : index
    %73 = vector.load %arg2[%c20, %c0_25] : memref<35x128xf32, #tpu.memory_space<vmem>>, vector<1x128xf32>
    %74 = vector.broadcast %73 : vector<1x128xf32> to vector<8x128xf32>
    %75 = arith.mulf %72, %74 : vector<8x128xf32>
    %76 = arith.addf %69, %75 : vector<8x128xf32>
    %77 = vector.extract_strided_slice %71 {offsets = [0, 4], sizes = [8, 128], strides = [1, 1]} : vector<8x144xf32> to vector<8x128xf32>
    %c4 = arith.constant 4 : index
    %c0_26 = arith.constant 0 : index
    %78 = vector.load %arg2[%c4, %c0_26] : memref<35x128xf32, #tpu.memory_space<vmem>>, vector<1x128xf32>
    %79 = vector.broadcast %78 : vector<1x128xf32> to vector<8x128xf32>
    %80 = arith.mulf %77, %79 : vector<8x128xf32>
    %81 = arith.addf %60, %80 : vector<8x128xf32>
    %c21 = arith.constant 21 : index
    %c0_27 = arith.constant 0 : index
    %82 = vector.load %arg2[%c21, %c0_27] : memref<35x128xf32, #tpu.memory_space<vmem>>, vector<1x128xf32>
    %83 = vector.broadcast %82 : vector<1x128xf32> to vector<8x128xf32>
    %84 = arith.mulf %77, %83 : vector<8x128xf32>
    %85 = arith.addf %76, %84 : vector<8x128xf32>
    %86 = vector.extract_strided_slice %71 {offsets = [0, 8], sizes = [8, 128], strides = [1, 1]} : vector<8x144xf32> to vector<8x128xf32>
    %c0_28 = arith.constant 0 : index
    %c0_29 = arith.constant 0 : index
    %87 = vector.load %arg2[%c0_28, %c0_29] : memref<35x128xf32, #tpu.memory_space<vmem>>, vector<1x128xf32>
    %88 = vector.broadcast %87 : vector<1x128xf32> to vector<8x128xf32>
    %89 = arith.mulf %86, %88 : vector<8x128xf32>
    %c0_30 = arith.constant 0 : index
    %c0_31 = arith.constant 0 : index
    %90 = vector.load %arg3[%c0_30, %c0_31] : memref<3x128xf32, #tpu.memory_space<vmem>>, vector<1x128xf32>
    %91 = vector.broadcast %90 : vector<1x128xf32> to vector<8x128xf32>
    %92 = arith.addf %91, %89 : vector<8x128xf32>
    %c5 = arith.constant 5 : index
    %c0_32 = arith.constant 0 : index
    %93 = vector.load %arg2[%c5, %c0_32] : memref<35x128xf32, #tpu.memory_space<vmem>>, vector<1x128xf32>
    %94 = vector.broadcast %93 : vector<1x128xf32> to vector<8x128xf32>
    %95 = arith.mulf %86, %94 : vector<8x128xf32>
    %96 = arith.addf %81, %95 : vector<8x128xf32>
    %c22 = arith.constant 22 : index
    %c0_33 = arith.constant 0 : index
    %97 = vector.load %arg2[%c22, %c0_33] : memref<35x128xf32, #tpu.memory_space<vmem>>, vector<1x128xf32>
    %98 = vector.broadcast %97 : vector<1x128xf32> to vector<8x128xf32>
    %99 = arith.mulf %86, %98 : vector<8x128xf32>
    %100 = arith.addf %85, %99 : vector<8x128xf32>
    %101 = vector.extract_strided_slice %71 {offsets = [0, 12], sizes = [8, 128], strides = [1, 1]} : vector<8x144xf32> to vector<8x128xf32>
    %c6 = arith.constant 6 : index
    %c0_34 = arith.constant 0 : index
    %102 = vector.load %arg2[%c6, %c0_34] : memref<35x128xf32, #tpu.memory_space<vmem>>, vector<1x128xf32>
    %103 = vector.broadcast %102 : vector<1x128xf32> to vector<8x128xf32>
    %104 = arith.mulf %101, %103 : vector<8x128xf32>
    %105 = arith.addf %96, %104 : vector<8x128xf32>
    %c23 = arith.constant 23 : index
    %c0_35 = arith.constant 0 : index
    %106 = vector.load %arg2[%c23, %c0_35] : memref<35x128xf32, #tpu.memory_space<vmem>>, vector<1x128xf32>
    %107 = vector.broadcast %106 : vector<1x128xf32> to vector<8x128xf32>
    %108 = arith.mulf %101, %107 : vector<8x128xf32>
    %109 = arith.addf %100, %108 : vector<8x128xf32>
    %110 = vector.extract_strided_slice %71 {offsets = [0, 16], sizes = [8, 128], strides = [1, 1]} : vector<8x144xf32> to vector<8x128xf32>
    %c24 = arith.constant 24 : index
    %c0_36 = arith.constant 0 : index
    %111 = vector.load %arg2[%c24, %c0_36] : memref<35x128xf32, #tpu.memory_space<vmem>>, vector<1x128xf32>
    %112 = vector.broadcast %111 : vector<1x128xf32> to vector<8x128xf32>
    %113 = arith.mulf %110, %112 : vector<8x128xf32>
    %114 = arith.addf %109, %113 : vector<8x128xf32>
    %c0_37 = arith.constant 0 : index
    %c3_38 = arith.constant 3 : index
    %c0_39 = arith.constant 0 : index
    %115 = vector.load %arg1[%c0_37, %c3_38, %c0_39] : memref<1x12x144xf32, #tpu.memory_space<vmem>>, vector<1x8x144xf32>
    %116 = vector.shape_cast %115 : vector<1x8x144xf32> to vector<8x144xf32>
    %117 = vector.extract_strided_slice %116 {offsets = [0, 0], sizes = [8, 128], strides = [1, 1]} : vector<8x144xf32> to vector<8x128xf32>
    %c25 = arith.constant 25 : index
    %c0_40 = arith.constant 0 : index
    %118 = vector.load %arg2[%c25, %c0_40] : memref<35x128xf32, #tpu.memory_space<vmem>>, vector<1x128xf32>
    %119 = vector.broadcast %118 : vector<1x128xf32> to vector<8x128xf32>
    %120 = arith.mulf %117, %119 : vector<8x128xf32>
    %121 = arith.addf %114, %120 : vector<8x128xf32>
    %122 = vector.extract_strided_slice %116 {offsets = [0, 4], sizes = [8, 128], strides = [1, 1]} : vector<8x144xf32> to vector<8x128xf32>
    %c7 = arith.constant 7 : index
    %c0_41 = arith.constant 0 : index
    %123 = vector.load %arg2[%c7, %c0_41] : memref<35x128xf32, #tpu.memory_space<vmem>>, vector<1x128xf32>
    %124 = vector.broadcast %123 : vector<1x128xf32> to vector<8x128xf32>
    %125 = arith.mulf %122, %124 : vector<8x128xf32>
    %126 = arith.addf %105, %125 : vector<8x128xf32>
    %c26 = arith.constant 26 : index
    %c0_42 = arith.constant 0 : index
    %127 = vector.load %arg2[%c26, %c0_42] : memref<35x128xf32, #tpu.memory_space<vmem>>, vector<1x128xf32>
    %128 = vector.broadcast %127 : vector<1x128xf32> to vector<8x128xf32>
    %129 = arith.mulf %122, %128 : vector<8x128xf32>
    %130 = arith.addf %121, %129 : vector<8x128xf32>
    %131 = vector.extract_strided_slice %116 {offsets = [0, 8], sizes = [8, 128], strides = [1, 1]} : vector<8x144xf32> to vector<8x128xf32>
    %c8 = arith.constant 8 : index
    %c0_43 = arith.constant 0 : index
    %132 = vector.load %arg2[%c8, %c0_43] : memref<35x128xf32, #tpu.memory_space<vmem>>, vector<1x128xf32>
    %133 = vector.broadcast %132 : vector<1x128xf32> to vector<8x128xf32>
    %134 = arith.mulf %131, %133 : vector<8x128xf32>
    %135 = arith.addf %126, %134 : vector<8x128xf32>
    %c27 = arith.constant 27 : index
    %c0_44 = arith.constant 0 : index
    %136 = vector.load %arg2[%c27, %c0_44] : memref<35x128xf32, #tpu.memory_space<vmem>>, vector<1x128xf32>
    %137 = vector.broadcast %136 : vector<1x128xf32> to vector<8x128xf32>
    %138 = arith.mulf %131, %137 : vector<8x128xf32>
    %139 = arith.addf %130, %138 : vector<8x128xf32>
    %140 = vector.extract_strided_slice %116 {offsets = [0, 12], sizes = [8, 128], strides = [1, 1]} : vector<8x144xf32> to vector<8x128xf32>
    %c9 = arith.constant 9 : index
    %c0_45 = arith.constant 0 : index
    %141 = vector.load %arg2[%c9, %c0_45] : memref<35x128xf32, #tpu.memory_space<vmem>>, vector<1x128xf32>
    %142 = vector.broadcast %141 : vector<1x128xf32> to vector<8x128xf32>
    %143 = arith.mulf %140, %142 : vector<8x128xf32>
    %144 = arith.addf %135, %143 : vector<8x128xf32>
    %c28 = arith.constant 28 : index
    %c0_46 = arith.constant 0 : index
    %145 = vector.load %arg2[%c28, %c0_46] : memref<35x128xf32, #tpu.memory_space<vmem>>, vector<1x128xf32>
    %146 = vector.broadcast %145 : vector<1x128xf32> to vector<8x128xf32>
    %147 = arith.mulf %140, %146 : vector<8x128xf32>
    %148 = arith.addf %139, %147 : vector<8x128xf32>
    %149 = vector.extract_strided_slice %116 {offsets = [0, 16], sizes = [8, 128], strides = [1, 1]} : vector<8x144xf32> to vector<8x128xf32>
    %c29 = arith.constant 29 : index
    %c0_47 = arith.constant 0 : index
    %150 = vector.load %arg2[%c29, %c0_47] : memref<35x128xf32, #tpu.memory_space<vmem>>, vector<1x128xf32>
    %151 = vector.broadcast %150 : vector<1x128xf32> to vector<8x128xf32>
    %152 = arith.mulf %149, %151 : vector<8x128xf32>
    %153 = arith.addf %148, %152 : vector<8x128xf32>
    %c0_48 = arith.constant 0 : index
    %c4_49 = arith.constant 4 : index
    %c0_50 = arith.constant 0 : index
    %154 = vector.load %arg1[%c0_48, %c4_49, %c0_50] : memref<1x12x144xf32, #tpu.memory_space<vmem>>, vector<1x8x144xf32>
    %155 = vector.shape_cast %154 : vector<1x8x144xf32> to vector<8x144xf32>
    %156 = vector.extract_strided_slice %155 {offsets = [0, 0], sizes = [8, 128], strides = [1, 1]} : vector<8x144xf32> to vector<8x128xf32>
    %c30 = arith.constant 30 : index
    %c0_51 = arith.constant 0 : index
    %157 = vector.load %arg2[%c30, %c0_51] : memref<35x128xf32, #tpu.memory_space<vmem>>, vector<1x128xf32>
    %158 = vector.broadcast %157 : vector<1x128xf32> to vector<8x128xf32>
    %159 = arith.mulf %156, %158 : vector<8x128xf32>
    %160 = arith.addf %153, %159 : vector<8x128xf32>
    %161 = vector.extract_strided_slice %155 {offsets = [0, 4], sizes = [8, 128], strides = [1, 1]} : vector<8x144xf32> to vector<8x128xf32>
    %c31 = arith.constant 31 : index
    %c0_52 = arith.constant 0 : index
    %162 = vector.load %arg2[%c31, %c0_52] : memref<35x128xf32, #tpu.memory_space<vmem>>, vector<1x128xf32>
    %163 = vector.broadcast %162 : vector<1x128xf32> to vector<8x128xf32>
    %164 = arith.mulf %161, %163 : vector<8x128xf32>
    %165 = arith.addf %160, %164 : vector<8x128xf32>
    %166 = vector.extract_strided_slice %155 {offsets = [0, 8], sizes = [8, 128], strides = [1, 1]} : vector<8x144xf32> to vector<8x128xf32>
    %c32 = arith.constant 32 : index
    %c0_53 = arith.constant 0 : index
    %167 = vector.load %arg2[%c32, %c0_53] : memref<35x128xf32, #tpu.memory_space<vmem>>, vector<1x128xf32>
    %168 = vector.broadcast %167 : vector<1x128xf32> to vector<8x128xf32>
    %169 = arith.mulf %166, %168 : vector<8x128xf32>
    %170 = arith.addf %165, %169 : vector<8x128xf32>
    %171 = vector.extract_strided_slice %155 {offsets = [0, 12], sizes = [8, 128], strides = [1, 1]} : vector<8x144xf32> to vector<8x128xf32>
    %c33 = arith.constant 33 : index
    %c0_54 = arith.constant 0 : index
    %172 = vector.load %arg2[%c33, %c0_54] : memref<35x128xf32, #tpu.memory_space<vmem>>, vector<1x128xf32>
    %173 = vector.broadcast %172 : vector<1x128xf32> to vector<8x128xf32>
    %174 = arith.mulf %171, %173 : vector<8x128xf32>
    %175 = arith.addf %170, %174 : vector<8x128xf32>
    %176 = vector.extract_strided_slice %155 {offsets = [0, 16], sizes = [8, 128], strides = [1, 1]} : vector<8x144xf32> to vector<8x128xf32>
    %c34 = arith.constant 34 : index
    %c0_55 = arith.constant 0 : index
    %177 = vector.load %arg2[%c34, %c0_55] : memref<35x128xf32, #tpu.memory_space<vmem>>, vector<1x128xf32>
    %178 = vector.broadcast %177 : vector<1x128xf32> to vector<8x128xf32>
    %179 = arith.mulf %176, %178 : vector<8x128xf32>
    %180 = arith.addf %175, %179 : vector<8x128xf32>
    %cst = arith.constant 0.000000e+00 : f32
    %cst_56 = arith.constant 6.000000e+00 : f32
    %181 = vector.broadcast %cst : f32 to vector<8x128xf32>
    %182 = arith.maximumf %181, %92 : vector<8x128xf32>
    %183 = vector.broadcast %cst_56 : f32 to vector<8x128xf32>
    %184 = arith.minimumf %183, %182 : vector<8x128xf32>
    %cst_57 = arith.constant 0.000000e+00 : f32
    %cst_58 = arith.constant 6.000000e+00 : f32
    %185 = vector.broadcast %cst_57 : f32 to vector<8x128xf32>
    %186 = arith.maximumf %185, %144 : vector<8x128xf32>
    %187 = vector.broadcast %cst_58 : f32 to vector<8x128xf32>
    %188 = arith.minimumf %187, %186 : vector<8x128xf32>
    %189 = arith.mulf %184, %188 : vector<8x128xf32>
    %cst_59 = arith.constant 0.000000e+00 : f32
    %cst_60 = arith.constant 6.000000e+00 : f32
    %190 = vector.broadcast %cst_59 : f32 to vector<8x128xf32>
    %191 = arith.maximumf %190, %180 : vector<8x128xf32>
    %192 = vector.broadcast %cst_60 : f32 to vector<8x128xf32>
    %193 = arith.minimumf %192, %191 : vector<8x128xf32>
    %194 = arith.mulf %189, %193 : vector<8x128xf32>
    %c0_61 = arith.constant 0 : index
    %c0_62 = arith.constant 0 : index
    %c0_63 = arith.constant 0 : index
    %195 = vector.load %arg4[%c0_61, %c0_62, %c0_63] : memref<1x8x128xf32, #tpu.memory_space<vmem>>, vector<1x8x128xf32>
    %196 = vector.shape_cast %195 : vector<1x8x128xf32> to vector<8x128xf32>
    %197 = vector.shape_cast %194 : vector<8x128xf32> to vector<1x8x128xf32>
    tpu.vector_store %arg4[%c0_61, %c0_62, %c0_63], %197 {strides = array<i32>} : memref<1x8x128xf32, #tpu.memory_space<vmem>>, vector<1x8x128xf32>,
    return
  }
  func.func @transform_0(%arg0: i32) -> (i32, i32, i32) {
    %c0_i32 = arith.constant 0 : i32
    %c0_i32_0 = arith.constant 0 : i32
    %c0_i32_1 = arith.constant 0 : i32
    return %arg0, %c0_i32, %c0_i32_0 : i32, i32, i32
  }
  func.func @transform_1(%arg0: i32) -> (i32, i32) {
    %c0_i32 = arith.constant 0 : i32
    %c0_i32_0 = arith.constant 0 : i32
    %c0_i32_1 = arith.constant 0 : i32
    return %c0_i32, %c0_i32_0 : i32, i32
  }
  func.func @transform_2(%arg0: i32) -> (i32, i32) {
    %c0_i32 = arith.constant 0 : i32
    %c0_i32_0 = arith.constant 0 : i32
    %c0_i32_1 = arith.constant 0 : i32
    return %c0_i32, %c0_i32_0 : i32, i32
  }
  func.func @transform_3(%arg0: i32) -> (i32, i32, i32) {
    %c0_i32 = arith.constant 0 : i32
    %c0_i32_0 = arith.constant 0 : i32
    %c0_i32_1 = arith.constant 0 : i32
    return %arg0, %c0_i32, %c0_i32_0 : i32, i32, i32
  }
}

</mosaic_0001>

<bundles_post_ra>
// kernel: tpu_custom_call.1
= control target key start
LH: loop header
LB: loop body
LE: loop exit
PB: predicated region body
PF: predicated region fallthrough
CT: control target
= control target key end

     0   :  { %8 = vsyncpa [#allocation3], 0  ;;  %s1859_s0 = inlined_call_operand.vmem [shape: f32[4,12,144], index: 0, kind: input, shape index: {}]   ;;  %s1860_s1 = inlined_call_operand.vmem [shape: f32[35,128], index: 1, kind: input, shape index: {}]   ;;  %s1861_s2 = inlined_call_operand.vmem [shape: f32[3,128], index: 2, kind: input, shape index: {}]   ;;  %s1862_s3 = inlined_call_operand.hbm [shape: f32[4,8,128], index: 3, kind: output, shape index: {}]  }
   0x1   :  { %10 = vsyncpa [#allocation3 + $0x1], 0  ;;  %s1292_s12 = smov 0   ;;  %s1294_s13 = smov 0  }
   0x2   :  { %s1296_s14 = smov 0   ;;  %s1298_s15 = smov 0  }
   0x3 LB: > { %s1313_s16 = sadd.s32 4294967295, %s1262_s15   ;;  %s1103_s17 = sadd.s32 4294967294, %s1262_s15   ;;  %s1262_s15 = sphi %s1298_s15, %s1868_s15   ;;  %s1258_s14 = sphi %s1296_s14, %s1867_s14   ;;  %s1254_s13 = sphi %s1294_s13, %s1866_s13   ;;  %s1250_s12 = sphi %s1292_s12, %s1865_s12  }
   0x4   : > { %s1317_s18 = sadd.s32 1, %s1262_s15   ;;  %s91_s19 = sadd.s32 1, %s1258_s14 }
   0x5   : > { %s88_s20 = ssub.s32 %s1262_s15, %s1317_s18  ;;  %p101_p0 = scmp.ne.s32.totalorder %s1258_s14, %s1254_s13 }
   0x6   : > { %p89_p1 = scmp.eq.s32.totalorder %s88_s20, 0  ;;  %p102_p2 = scmp.eq.s32.totalorder %s1313_s16, 3 }
   0x7   : > { %p107_p3 = scmp.ne.s32.totalorder %s1254_s13, %s1250_s12  ;;  %p108_p4 = scmp.eq.s32.totalorder %s1103_s17, 3 }
   0x8   : > { %s1328_s21 = scalar_select %p89_p1, %s1258_s14, %s91_s19  }
   0x9   : > { %p1330_p5 = por %p102_p2, %p101_p0  ;;  %p1334_p6 = por %p108_p4, %p107_p3 }
   0xa   : > { %p1106_p7 = scmp.ge.s32.totalorder %s1262_s15, 1  ;;  %p140_p8 = scmp.lt.s32.totalorder %s1262_s15, 5 }
   0xc   : > { %p141_p9 = pnand %p1106_p7, %p140_p8 }
   0xd   : > { %s1264_s28 = smov (!%p141_p9), 8   ;;  %s1265_s29 = smov (!%p141_p9), 4  }
   0xe   : > { %144 = sbr.rel (%p141_p9) target bundleno = 574 (0x23e), region = 32  ;;  %s1266_s5 = smov (!%p141_p9), 12  }
   0xf   : > { %s1267_s8 = smov (!%p141_p9), 16   ;;  %p164_p10 = scmp.lt.s32.totalorder (!%p141_p9), %s1313_s16, 3 }
  0x10   : > { %s1268_s10 = smov (!%p141_p9), 120   ;;  %s1269_s11 = smov (!%p141_p9), 124  }
  0x11   : > { %s1270_s20 = smov (!%p141_p9), 116   ;;  %s161_s7 = sand.u32 (!%p141_p9), 1, %s1254_s13  }
  0x12   : > { %s1107_s17 = sshll.u32 (!%p141_p9), %s161_s7, 3  ;;  %s1111_s19 = sshll.u32 (!%p141_p9), %s1313_s16, 3 }
  0x13   : > { %v1162_v0 = vld [vmem:[%s1860_s1 + $0xc] ss:$0 sm:$0xff]  ;;  %v1163_v1 = vld [vmem:[%s1860_s1 + $0xb] ss:$0 sm:$0xff]  ;;  %v1164_v2 = vld [vmem:[%s1860_s1 + $0xd] ss:$0 sm:$0xff] }
  0x14   : > { %198 = vrot.lane.b32.xlu1 %v1162_v0, %s1264_s28  ;;  %180 = vrot.lane.b32.xlu0 %v1163_v1, %s1265_s29  ;;  %v1165_v3 = vld [vmem:[%s1860_s1 + $0xe] ss:$0 sm:$0xff]  ;;  %v1166_v4 = vld [vmem:[%s1860_s1 + $0x1] ss:$0 sm:$0xff]  ;;  %s165_s26 = scalar_select %p164_p10, %s1313_s16, 3  ;;  %vm259_vm0 = vcmask 1046528  }
  0x15   : > { %v1167_v5 = vld [vmem:[%s1860_s1 + $0x10] ss:$0 sm:$0xff]  ;;  %v1168_v6 = vld [vmem:[%s1860_s1 + $0x2] ss:$0 sm:$0xff]  ;;  %v1169_v7 = vld [vmem:[%s1860_s1 + $0x11] ss:$0 sm:$0xff] }
  0x16   : > { %v1170_v8 = vld [vmem:[%s1860_s1 + $0x3] ss:$0 sm:$0xff]  ;;  %v1171_v9 = vld [vmem:[%s1860_s1 + $0x12] ss:$0 sm:$0xff]  ;;  %v1172_v10 = vld [vmem:[%s1860_s1 + $0x13] ss:$0 sm:$0xff] }
  0x17   : > { %v1173_v11 = vld [vmem:[%s1860_s1 + $0x4] ss:$0 sm:$0xff]  ;;  %v1174_v12 = vld [vmem:[%s1860_s1 + $0x15] ss:$0 sm:$0xff]  ;;  %v1175_v13 = vld [vmem:[%s1860_s1] ss:$0 sm:$0xff] }
  0x18   : > { %v1176_v14 = vld [vmem:[%s1860_s1 + $0x5] ss:$0 sm:$0xff]  ;;  %s1114_s27 = sshll.u32 %s165_s26, 5  ;;  %v1177_v15 = vld [vmem:[%s1860_s1 + $0x16] ss:$0 sm:$0xff]  ;;  %s1271_s26 = smov 112  }
  0x19   : > { %s1408_s9 = scalar_lea.vmem %s1859_s0, %s1114_s27  ;;  %v1178_v26 = vld [vmem:[%s1860_s1 + $0x6] ss:$0 sm:$0xff]  ;;  %v1179_v30 = vld [vmem:[%s1860_s1 + $0x17] ss:$0 sm:$0xff]  ;;  %vm466_vm1 = vcmask 1045504   ;;  %vm209_vm2 = vcmask 982016   ;;  %s1039_s27 = scalar_lea.hbm %s1862_s3, %s1111_s19 }
  0x1a   : > { %v1411_v16 = vld [vmem:[%s1408_s9] sm:$0xff]  ;;  %v170_v17 = vld [vmem:[%s1408_s9 + $0x8] sm:$0xff]  ;;  %v1441_v33 = vld [vmem:[%s1408_s9 + $0x10] sm:$0x1]  ;;  %vm191_vm3 = vcmask 1014784   ;;  %vm227_vm4 = vcmask 949248  }
  0x1b   : > { %v1434_v31 = vld [vmem:[%s1408_s9] sm:$0xfe]  ;;  %v1438_v32 = vld [vmem:[%s1408_s9 + $0x8] sm:$0xfe]  ;;  %v1444_v34 = vld [vmem:[%s1408_s9 + $0x18] sm:$0x1] }
  0x1c   : > { %216 = vrot.lane.b32.xlu0 %v1164_v2, %s1266_s5  ;;  %vm245_vm5 = vcmask 916480   ;;  %vm700_vm6 = vcmask 1044480   ;;  %vm905_vm7 = vcmask 1043456   ;;  %s163_s30 = scalar_lea.vmem [#allocation2], %s1107_s17  ;;  %s1029_s6 = scalar_lea.sflag [#allocation3], %s161_s7 }
  0x1d   : > { %s1041_s4 = sshll.u32 %s163_s30, 4  ;;  %s1042_s4 = int_to_ptr.vmem [resolvable:$true] %s1041_s4 }
  0x24   : > { %234 = vrot.lane.b32.xlu0 %v1165_v3, %s1267_s8 }
  0x2c   : > { %268 = vrot.lane.b32.xlu0 %v1166_v4, %s1265_s29 }
  0x34   : > { %297 = vrot.lane.b32.xlu0 %v1167_v5, %s1265_s29 }
  0x3c   : > { %324 = vrot.lane.b32.xlu0 %v1168_v6, %s1264_s28 }
  0x44   : > { %351 = vrot.lane.b32.xlu0 %v1169_v7, %s1264_s28 }
  0x4c   : > { %378 = vrot.lane.b32.xlu0 %v1170_v8, %s1266_s5 }
  0x54   : > { %405 = vrot.lane.b32.xlu0 %v1171_v9, %s1266_s5 }
  0x5c   : > { %432 = vrot.lane.b32.xlu0 %v1172_v10, %s1267_s8 }
  0x64   : > { %475 = vrot.lane.b32.xlu0 %v1173_v11, %s1265_s29 }
  0x6c   : > { %502 = vrot.lane.b32.xlu0 %v1174_v12, %s1265_s29 }
  0x74   : > { %529 = vrot.lane.b32.xlu0 %v1175_v13, %s1264_s28 }
  0x7c   : > { %558 = vrot.lane.b32.xlu0 %v1176_v14, %s1264_s28 }
  0x84   : > { %585 = vrot.lane.b32.xlu0 %v1177_v15, %s1264_s28 }
  0x86   : > { %v199_v18 = vpop.permute.xlu1 %198  ;;  %v181_v19 = vpop.permute.xlu0 %180 }
  0x87   : > { %v201_v20 = vmul.f32 %v199_v18, %v1411_v16  ;;  %v184_v21 = vmul.f32 %v181_v19, %v170_v17  ;;  %v183_v22 = vmul.f32 %v181_v19, %v1411_v16  ;;  %v202_v23 = vmul.f32 %v199_v18, %v170_v17 }
  0x89   : > { %205 = vrot.lane.b32.xlu2 %v201_v20, %s1268_s10  ;;  %189 = vrot.lane.b32.xlu1 %v184_v21, %s1269_s11 }
  0x8c   : > { %187 = vrot.lane.b32.xlu0 %v183_v22, %s1269_s11 }
  0x8e   : > { %v217_v24 = vpop.permute.xlu0 %216 }
  0x8f   : > { %v219_v25 = vmul.f32 %v217_v24, %v1411_v16  ;;  %v220_v27 = vmul.f32 %v217_v24, %v170_v17 }
  0x91   : > { %207 = vrot.lane.b32.xlu2 %v202_v23, %s1268_s10  ;;  %223 = vrot.lane.b32.xlu1 %v219_v25, %s1270_s20 }
  0x94   : > { %612 = vrot.lane.b32.xlu0 %v1178_v26, %s1266_s5 }
  0x96   : > { %v235_v28 = vpop.permute.xlu0 %234 }
  0x97   : > { %v237_v29 = vmul.f32 %v235_v28, %v1411_v16  ;;  %v238_v35 = vmul.f32 %v235_v28, %v170_v17 }
  0x99   : > { %225 = vrot.lane.b32.xlu2 %v220_v27, %s1270_s20  ;;  %241 = vrot.lane.b32.xlu1 %v237_v29, %s1271_s26 }
  0x9c   : > { %639 = vrot.lane.b32.xlu0 %v1179_v30, %s1266_s5 }
  0x9e   : > { %v269_v36 = vpop.permute.xlu0 %268 }
  0x9f   : > { %v271_v37 = vmul.f32 %v269_v36, %v1434_v31  ;;  %v272_v38 = vmul.f32 %v269_v36, %v1438_v32  ;;  %v273_v39 = vmul.f32 %v269_v36, %v1441_v33  ;;  %v274_v40 = vmul.f32 %v269_v36, %v1444_v34 }
  0xa1   : > { %243 = vrot.lane.b32.xlu2 %v238_v35, %s1271_s26  ;;  %v281_v41 = vrot.slane %v271_v37, 1  ;;  %v282_v42 = vrot.slane %v273_v39, 1  ;;  %v284_v43 = vrot.slane %v272_v38, 1  ;;  %v285_v44 = vrot.slane %v274_v40, 1 }
  0xa3   : > { %v283_v45 = vsel %vm259_vm0, %v281_v41, %v282_v42  ;;  %v286_v47 = vsel %vm259_vm0, %v284_v43, %v285_v44 }
  0xa4   : > { %287 = vrot.lane.b32.xlu1 %v283_v45, %s1269_s11 }
  0xa6   : > { %v298_v46 = vpop.permute.xlu0 %297 }
  0xa7   : > { %v300_v48 = vmul.f32 %v298_v46, %v1434_v31  ;;  %v301_v49 = vmul.f32 %v298_v46, %v1438_v32  ;;  %v302_v50 = vmul.f32 %v298_v46, %v1441_v33  ;;  %v303_v51 = vmul.f32 %v298_v46, %v1444_v34 }
  0xa9   : > { %289 = vrot.lane.b32.xlu2 %v286_v47, %s1269_s11  ;;  %v308_v52 = vrot.slane %v300_v48, 1  ;;  %v309_v53 = vrot.slane %v302_v50, 1  ;;  %v311_v54 = vrot.slane %v301_v49, 1  ;;  %v312_v55 = vrot.slane %v303_v51, 1 }
  0xab   : > { %v310_v56 = vsel %vm259_vm0, %v308_v52, %v309_v53  ;;  %v313_v58 = vsel %vm259_vm0, %v311_v54, %v312_v55  ;;  %v1501_v53 = vld [vmem:[%s1408_s9] sm:$0xfc]  ;;  %v1505_v54 = vld [vmem:[%s1408_s9 + $0x8] sm:$0xfc]  ;;  %v1508_v55 = vld [vmem:[%s1408_s9 + $0x10] sm:$0x3] }
  0xac   : > { %314 = vrot.lane.b32.xlu1 %v310_v56, %s1269_s11 }
  0xae   : > { %v325_v57 = vpop.permute.xlu0 %324 }
  0xaf   : > { %v327_v59 = vmul.f32 %v325_v57, %v1434_v31  ;;  %v328_v60 = vmul.f32 %v325_v57, %v1438_v32  ;;  %v329_v61 = vmul.f32 %v325_v57, %v1441_v33  ;;  %v330_v62 = vmul.f32 %v325_v57, %v1444_v34 }
  0xb1   : > { %316 = vrot.lane.b32.xlu2 %v313_v58, %s1269_s11  ;;  %v335_v63 = vrot.slane %v327_v59, 1  ;;  %v336_v0 = vrot.slane %v329_v61, 1  ;;  %v338_v1 = vrot.slane %v328_v60, 1  ;;  %v339_v2 = vrot.slane %v330_v62, 1 }
  0xb3   : > { %v337_v3 = vsel %vm259_vm0, %v335_v63, %v336_v0  ;;  %v340_v5 = vsel %vm259_vm0, %v338_v1, %v339_v2 }
  0xb4   : > { %341 = vrot.lane.b32.xlu1 %v337_v3, %s1268_s10 }
  0xb6   : > { %v352_v4 = vpop.permute.xlu0 %351 }
  0xb7   : > { %v354_v6 = vmul.f32 %v352_v4, %v1434_v31  ;;  %v355_v7 = vmul.f32 %v352_v4, %v1438_v32  ;;  %v356_v8 = vmul.f32 %v352_v4, %v1441_v33  ;;  %v357_v9 = vmul.f32 %v352_v4, %v1444_v34 }
  0xb9   : > { %343 = vrot.lane.b32.xlu2 %v340_v5, %s1268_s10  ;;  %v362_v10 = vrot.slane %v354_v6, 1  ;;  %v363_v11 = vrot.slane %v356_v8, 1  ;;  %v365_v12 = vrot.slane %v355_v7, 1  ;;  %v366_v13 = vrot.slane %v357_v9, 1 }
  0xbb   : > { %v364_v14 = vsel %vm259_vm0, %v362_v10, %v363_v11  ;;  %v367_v17 = vsel %vm259_vm0, %v365_v12, %v366_v13  ;;  %v1182_v13 = vld [vmem:[%s1860_s1 + $0x1a] ss:$0 sm:$0xff] }
  0xbc   : > { %368 = vrot.lane.b32.xlu1 %v364_v14, %s1268_s10  ;;  %736 = vrot.lane.b32.xlu0 %v1182_v13, %s1265_s29 }
  0xbe   : > { %v379_v15 = vpop.permute.xlu0 %378 }
  0xbf   : > { %v381_v18 = vmul.f32 %v379_v15, %v1434_v31  ;;  %v382_v19 = vmul.f32 %v379_v15, %v1438_v32  ;;  %v383_v20 = vmul.f32 %v379_v15, %v1441_v33  ;;  %v384_v21 = vmul.f32 %v379_v15, %v1444_v34 }
  0xc1   : > { %370 = vrot.lane.b32.xlu2 %v367_v17, %s1268_s10  ;;  %v389_v22 = vrot.slane %v381_v18, 1  ;;  %v390_v23 = vrot.slane %v383_v20, 1  ;;  %v392_v24 = vrot.slane %v382_v19, 1  ;;  %v393_v25 = vrot.slane %v384_v21, 1 }
  0xc3   : > { %v391_v26 = vsel %vm259_vm0, %v389_v22, %v390_v23  ;;  %v394_v28 = vsel %vm259_vm0, %v392_v24, %v393_v25 }
  0xc4   : > { %395 = vrot.lane.b32.xlu1 %v391_v26, %s1270_s20 }
  0xc6   : > { %v406_v27 = vpop.permute.xlu0 %405 }
  0xc7   : > { %v408_v29 = vmul.f32 %v406_v27, %v1434_v31  ;;  %v409_v30 = vmul.f32 %v406_v27, %v1438_v32  ;;  %v410_v35 = vmul.f32 %v406_v27, %v1441_v33  ;;  %v411_v36 = vmul.f32 %v406_v27, %v1444_v34 }
  0xc9   : > { %397 = vrot.lane.b32.xlu2 %v394_v28, %s1270_s20  ;;  %v416_v37 = vrot.slane %v408_v29, 1  ;;  %v417_v38 = vrot.slane %v410_v35, 1  ;;  %v419_v39 = vrot.slane %v409_v30, 1  ;;  %v420_v40 = vrot.slane %v411_v36, 1 }
  0xcb   : > { %v418_v41 = vsel %vm259_vm0, %v416_v37, %v417_v38  ;;  %v421_v43 = vsel %vm259_vm0, %v419_v39, %v420_v40 }
  0xcc   : > { %422 = vrot.lane.b32.xlu1 %v418_v41, %s1270_s20 }
  0xce   : > { %v433_v42 = vpop.permute.xlu0 %432 }
  0xcf   : > { %v435_v44 = vmul.f32 %v433_v42, %v1434_v31  ;;  %v436_v45 = vmul.f32 %v433_v42, %v1438_v32  ;;  %v437_v46 = vmul.f32 %v433_v42, %v1441_v33  ;;  %v438_v47 = vmul.f32 %v433_v42, %v1444_v34  ;;  %v1511_v32 = vld [vmem:[%s1408_s9 + $0x18] sm:$0x3] }
  0xd1   : > { %424 = vrot.lane.b32.xlu2 %v421_v43, %s1270_s20  ;;  %v443_v48 = vrot.slane %v435_v44, 1  ;;  %v444_v49 = vrot.slane %v437_v46, 1  ;;  %v446_v50 = vrot.slane %v436_v45, 1  ;;  %v447_v51 = vrot.slane %v438_v47, 1  ;;  %v1180_v45 = vld [vmem:[%s1860_s1 + $0xa] ss:$0 sm:$0xff] }
  0xd3   : > { %v445_v52 = vsel %vm259_vm0, %v443_v48, %v444_v49  ;;  %v448_v34 = vsel %vm259_vm0, %v446_v50, %v447_v51 }
  0xd4   : > { %449 = vrot.lane.b32.xlu1 %v445_v52, %s1271_s26  ;;  %v1181_v52 = vld [vmem:[%s1861_s2 + $0x2] ss:$0 sm:$0xff] }
  0xd6   : > { %v476_v56 = vpop.permute.xlu0 %475 }
  0xd7   : > { %v478_v57 = vmul.f32 %v476_v56, %v1501_v53  ;;  %v479_v58 = vmul.f32 %v476_v56, %v1505_v54  ;;  %v480_v59 = vmul.f32 %v476_v56, %v1508_v55  ;;  %v481_v60 = vmul.f32 %v476_v56, %v1511_v32 }
  0xd8   : > { %v173_v56 = vmul.f32 %v1180_v45, %v1411_v16  ;;  %v1185_v45 = vld [vmem:[%s1860_s1 + $0x1c] ss:$0 sm:$0xff] }
  0xd9   : > { %451 = vrot.lane.b32.xlu2 %v448_v34, %s1271_s26  ;;  %v486_v61 = vrot.slane %v478_v57, 2  ;;  %v487_v62 = vrot.slane %v480_v59, 2  ;;  %v489_v63 = vrot.slane %v479_v58, 2  ;;  %v490_v0 = vrot.slane %v481_v60, 2 }
  0xdb   : > { %v488_v1 = vsel %vm466_vm1, %v486_v61, %v487_v62  ;;  %v491_v3 = vsel %vm466_vm1, %v489_v63, %v490_v0  ;;  %v176_v63 = vadd.f32 %v1181_v52, %v173_v56  ;;  %v1190_v52 = vld [vmem:[%s1860_s1 + $0x7] ss:$0 sm:$0xff]  ;;  %v1184_v56 = vld [vmem:[%s1861_s2 + $0x1] ss:$0 sm:$0xff] }
  0xdc   : > { %492 = vrot.lane.b32.xlu1 %v488_v1, %s1269_s11 }
  0xde   : > { %v503_v2 = vpop.permute.xlu0 %502 }
  0xdf   : > { %v505_v4 = vmul.f32 %v503_v2, %v1501_v53  ;;  %v506_v5 = vmul.f32 %v503_v2, %v1505_v54  ;;  %v507_v6 = vmul.f32 %v503_v2, %v1508_v55  ;;  %v508_v7 = vmul.f32 %v503_v2, %v1511_v32 }
  0xe1   : > { %494 = vrot.lane.b32.xlu2 %v491_v3, %s1269_s11  ;;  %v513_v8 = vrot.slane %v505_v4, 2  ;;  %v514_v9 = vrot.slane %v507_v6, 2  ;;  %v516_v11 = vrot.slane %v506_v5, 2  ;;  %v517_v12 = vrot.slane %v508_v7, 2  ;;  %v1188_v5 = vld [vmem:[%s1860_s1 + $0x1d] ss:$0 sm:$0xff] }
  0xe2   : > { %871 = vrot.lane.b32.xlu0 %v1188_v5, %s1267_s8 }
  0xe3   : > { %v206_v10 = vpop.permute.xlu2 %205  ;;  %v515_v14 = vsel %vm466_vm1, %v513_v8, %v514_v9  ;;  %v518_v17 = vsel %vm466_vm1, %v516_v11, %v517_v12 }
  0xe4   : > { %519 = vrot.lane.b32.xlu1 %v515_v14, %s1269_s11 }
  0xe6   : > { %v530_v15 = vpop.permute.xlu0 %529 }
  0xe7   : > { %v532_v18 = vmul.f32 %v530_v15, %v1501_v53  ;;  %v533_v19 = vmul.f32 %v530_v15, %v1505_v54  ;;  %v534_v20 = vmul.f32 %v530_v15, %v1508_v55  ;;  %v535_v21 = vmul.f32 %v530_v15, %v1511_v32 }
  0xe9   : > { %521 = vrot.lane.b32.xlu2 %v518_v17, %s1269_s11  ;;  %v542_v22 = vrot.slane %v532_v18, 2  ;;  %v543_v23 = vrot.slane %v534_v20, 2  ;;  %v545_v25 = vrot.slane %v533_v19, 2  ;;  %v546_v26 = vrot.slane %v535_v21, 2 }
  0xeb   : > { %v208_v24 = vpop.permute.xlu2 %207  ;;  %v544_v28 = vsel %vm466_vm1, %v542_v22, %v543_v23  ;;  %v547_v30 = vsel %vm466_vm1, %v545_v25, %v546_v26 }
  0xec   : > { %v210_v27 = vsel %vm209_vm2, %v206_v10, %v208_v24  ;;  %548 = vrot.lane.b32.xlu1 %v544_v28, %s1268_s10  ;;  %v1187_v28 = vld [vmem:[%s1860_s1 + $0xf] ss:$0 sm:$0xff] }
  0xee   : > { %v559_v29 = vpop.permute.xlu0 %558 }
  0xef   : > { %v561_v35 = vmul.f32 %v559_v29, %v1501_v53  ;;  %v562_v36 = vmul.f32 %v559_v29, %v1505_v54  ;;  %v563_v37 = vmul.f32 %v559_v29, %v1508_v55  ;;  %v564_v38 = vmul.f32 %v559_v29, %v1511_v32  ;;  %v1183_v29 = vld [vmem:[%s1860_s1 + $0x18] ss:$0 sm:$0xff] }
  0xf1   : > { %550 = vrot.lane.b32.xlu2 %v547_v30, %s1268_s10  ;;  %v569_v39 = vrot.slane %v561_v35, 2  ;;  %v570_v40 = vrot.slane %v563_v37, 2  ;;  %v572_v42 = vrot.slane %v562_v36, 2  ;;  %v573_v43 = vrot.slane %v564_v38, 2  ;;  %v1192_v37 = vld [vmem:[%s1860_s1 + $0x8] ss:$0 sm:$0xff] }
  0xf2   : > { %763 = vrot.lane.b32.xlu0 %v1192_v37, %s1264_s28 }
  0xf3   : > { %v226_v41 = vpop.permute.xlu2 %225  ;;  %v571_v44 = vsel %vm466_vm1, %v569_v39, %v570_v40  ;;  %v574_v47 = vsel %vm466_vm1, %v572_v42, %v573_v43  ;;  %v255_v39 = vmul.f32 %v1187_v28, %v1434_v31  ;;  %v256_v40 = vmul.f32 %v1187_v28, %v1441_v33  ;;  %v1186_v31 = vld [vmem:[%s1860_s1 + $0x1b] ss:$0 sm:$0xff] }
  0xf4   : > { %575 = vrot.lane.b32.xlu1 %v571_v44, %s1268_s10 }
  0xf5   : > { %v260_v43 = vrot.slane %v255_v39, 1  ;;  %v261_v44 = vrot.slane %v256_v40, 1 }
  0xf6   : > { %v586_v46 = vpop.permute.xlu0 %585 }
  0xf7   : > { %v588_v48 = vmul.f32 %v586_v46, %v1501_v53  ;;  %v589_v49 = vmul.f32 %v586_v46, %v1505_v54  ;;  %v590_v50 = vmul.f32 %v586_v46, %v1508_v55  ;;  %v591_v51 = vmul.f32 %v586_v46, %v1511_v32 }
  0xf8   : > { %v262_v46 = vsel %vm259_vm0, %v260_v43, %v261_v44 }
  0xf9   : > { %577 = vrot.lane.b32.xlu2 %v574_v47, %s1268_s10  ;;  %v596_v34 = vrot.slane %v588_v48, 2  ;;  %v597_v57 = vrot.slane %v590_v50, 2  ;;  %v599_v61 = vrot.slane %v589_v49, 2  ;;  %v600_v62 = vrot.slane %v591_v51, 2  ;;  %v1189_v51 = vld [vmem:[%s1860_s1 + $0x1f] ss:$0 sm:$0xff] }
  0xfb   : > { %v244_v58 = vpop.permute.xlu2 %243  ;;  %v190_v59 = vpop.permute.xlu1 %189  ;;  %v598_v60 = vsel %vm466_vm1, %v596_v34, %v597_v57  ;;  %v601_v2 = vsel %vm466_vm1, %v599_v61, %v600_v62  ;;  %v1194_v57 = vld [vmem:[%s1860_s1 + $0x21] ss:$0 sm:$0xff]  ;;  %v1191_v62 = vld [vmem:[%s1860_s1 + $0x9] ss:$0 sm:$0xff] }
  0xfc   : > { %602 = vrot.lane.b32.xlu1 %v598_v60, %s1268_s10  ;;  %968 = vrot.lane.b32.xlu0 %v1194_v57, %s1266_s5  ;;  %v1669_v57 = vld [vmem:[%s1408_s9 + $0x8] sm:$0xf8] }
  0xfe   : > { %v188_v0 = vpop.permute.xlu0 %187 }
  0xff   : > { %v192_v1 = vsel %vm191_vm3, %v188_v0, %v190_v59 }
 0x100   : > { %v194_v3 = vadd.f32 %v192_v1, %v176_v63  ;;  %v1193_v63 = vld [vmem:[%s1860_s1 + $0x20] ss:$0 sm:$0xff] }
 0x101   : > { %604 = vrot.lane.b32.xlu2 %v601_v2, %s1268_s10 }
 0x102   : > { %v212_v16 = vadd.f32 %v210_v27, %v194_v3 }
 0x103   : > { %v290_v4 = vpop.permute.xlu2 %289  ;;  %v224_v6 = vpop.permute.xlu1 %223 }
 0x104   : > { %v228_v7 = vsel %vm227_vm4, %v224_v6, %v226_v41 }
 0x105   : > { %v230_v8 = vadd.f32 %v228_v7, %v212_v16  ;;  %v1195_v7 = vld [vmem:[%s1860_s1 + $0x22] ss:$0 sm:$0xff] }
 0x106   : > { %v613_v9 = vpop.permute.xlu0 %612 }
 0x107   : > { %v615_v10 = vmul.f32 %v613_v9, %v1501_v53  ;;  %v616_v11 = vmul.f32 %v613_v9, %v1505_v54  ;;  %v617_v12 = vmul.f32 %v613_v9, %v1508_v55  ;;  %v618_v13 = vmul.f32 %v613_v9, %v1511_v32 }
 0x109   : > { %v626_v14 = vrot.slane %v616_v11, 2  ;;  %v627_v15 = vrot.slane %v618_v13, 2  ;;  %v623_v17 = vrot.slane %v615_v10, 2  ;;  %v624_v18 = vrot.slane %v617_v12, 2 }
 0x10b   : > { %v317_v19 = vpop.permute.xlu2 %316  ;;  %v242_v20 = vpop.permute.xlu1 %241  ;;  %v628_v21 = vsel %vm466_vm1, %v626_v14, %v627_v15  ;;  %v625_v22 = vsel %vm466_vm1, %v623_v17, %v624_v18 }
 0x10c   : > { %v246_v23 = vsel %vm245_vm5, %v242_v20, %v244_v58  ;;  %631 = vrot.lane.b32.xlu2 %v628_v21, %s1270_s20  ;;  %629 = vrot.lane.b32.xlu1 %v625_v22, %s1270_s20  ;;  %v1196_v21 = vld [vmem:[%s1860_s1 + $0x14] ss:$0 sm:$0xff] }
 0x10d   : > { %v248_v24 = vadd.f32 %v246_v23, %v230_v8 }
 0x10e   : > { %v640_v25 = vpop.permute.xlu0 %639 }
 0x10f   : > { %v642_v26 = vmul.f32 %v640_v25, %v1501_v53  ;;  %v644_v27 = vmul.f32 %v640_v25, %v1508_v55  ;;  %v264_v48 = vadd.f32 %v262_v46, %v248_v24  ;;  %v643_v1 = vmul.f32 %v640_v25, %v1505_v54  ;;  %v1659_v46 = vld [vmem:[%s1408_s9] sm:$0xf8] }
 0x110   : > { %v645_v2 = vmul.f32 %v640_v25, %v1511_v32  ;;  %v462_v24 = vmul.f32 %v1196_v21, %v1501_v53  ;;  %v463_v25 = vmul.f32 %v1196_v21, %v1508_v55 }
 0x111   : > { %v650_v30 = vrot.slane %v642_v26, 2  ;;  %v651_v35 = vrot.slane %v644_v27, 2 }
 0x112   : > { %v654_v5 = vrot.slane %v645_v2, 2  ;;  %v467_v28 = vrot.slane %v462_v24, 2 }
 0x113   : > { %v344_v36 = vpop.permute.xlu2 %343  ;;  %v652_v38 = vsel %vm466_vm1, %v650_v30, %v651_v35 }
 0x114   : > { %666 = vrot.lane.b32.xlu2 %v1183_v29, %s1267_s8  ;;  %656 = vrot.lane.b32.xlu1 %v652_v38, %s1270_s20  ;;  %v468_v29 = vrot.slane %v463_v25, 2 }
 0x116   : > { %v288_v41 = vpop.permute.xlu1 %287  ;;  %v469_v35 = vsel %vm466_vm1, %v467_v28, %v468_v29 }
 0x117   : > { %v291_v42 = vsel %vm191_vm3, %v288_v41, %v290_v4  ;;  %v653_v4 = vrot.slane %v643_v1, 2 }
 0x118   : > { %v293_v58 = vadd.f32 %v1184_v56, %v291_v42 }
 0x119   : > { %v655_v9 = vsel %vm466_vm1, %v653_v4, %v654_v5 }
 0x11b   : > { %v371_v33 = vpop.permute.xlu2 %370 }
 0x11c   : > { %844 = vrot.lane.b32.xlu2 %v1185_v45, %s1266_s5  ;;  %790 = vrot.lane.b32.xlu1 %v1186_v31, %s1264_s28 }
 0x11e   : > { %v315_v47 = vpop.permute.xlu1 %314 }
 0x11f   : > { %v318_v49 = vsel %vm191_vm3, %v315_v47, %v317_v19 }
 0x120   : > { %v320_v50 = vadd.f32 %v318_v49, %v264_v48 }
 0x123   : > { %v398_v34 = vpop.permute.xlu2 %397 }
 0x124   : > { %914 = vrot.lane.b32.xlu2 %v1189_v51, %s1265_s29  ;;  %709 = vrot.lane.b32.xlu1 %v1190_v52, %s1265_s29  ;;  %s1043_s29 = sshll.u32 %s1039_s27, 4  ;;  %s1044_s29 = int_to_ptr.hbm [resolvable:$true] %s1043_s29 }
 0x125   : > { %s1214_s16 = sshra.s32 %s1044_s29, 4  ;;  %s1215_s16 = int_to_ptr.hbm [resolvable:$true] %s1214_s16 }
 0x126   : > { %v342_v59 = vpop.permute.xlu1 %341  ;;  %p1221_p0 = scmp.lt.s32.totalorder %s1215_s16, %s1862_s3 }
 0x127   : > { %v345_v60 = vsel %vm209_vm2, %v342_v59, %v344_v36 }
 0x128   : > { %v347_v61 = vadd.f32 %v345_v60, %v293_v58  ;;  %v1672_v58 = vld [vmem:[%s1408_s9 + $0x18] sm:$0x7] }
 0x12b   : > { %v425_v0 = vpop.permute.xlu2 %424 }
 0x12c   : > { %817 = vrot.lane.b32.xlu2 %v1191_v62, %s1266_s5  ;;  %941 = vrot.lane.b32.xlu1 %v1193_v63, %s1264_s28  ;;  %s1216_s28 = scalar_lea.hbm %s1215_s16, 8 }
 0x12d   : > { %p1217_p11 = scmp.ne.s32.totalorder %s1215_s16, %s1216_s28 }
 0x12e   : > { %v369_v3 = vpop.permute.xlu1 %368  ;;  %v737_v47 = vpop.permute.xlu0 %736 }
 0x12f   : > { %v372_v16 = vsel %vm209_vm2, %v369_v3, %v371_v33  ;;  %p1218_p12 = pnand %p1217_p11, %p1330_p5 }
 0x130   : > { %v374_v6 = vadd.f32 %v372_v16, %v320_v50  ;;  %v1662_v50 = vld [vmem:[%s1408_s9 + $0x10] sm:$0x7] }
 0x131   : > { %v741_v1 = vmul.f32 %v737_v47, %v1662_v50  ;;  %p1219_p13 = pneg %p1218_p12 }
 0x133   : > { %v452_v8 = vpop.permute.xlu2 %451  ;;  %v748_v16 = vrot.slane %v741_v1, 3 }
 0x134   : > { %658 = vrot.lane.b32.xlu2 %v655_v9, %s1270_s20  ;;  %995 = vrot.lane.b32.xlu1 %v1195_v7, %s1267_s8 }
 0x136   : > { %v396_v10 = vpop.permute.xlu1 %395 }
 0x137   : > { %v399_v11 = vsel %vm227_vm4, %v396_v10, %v398_v34 }
 0x138   : > { %v401_v12 = vadd.f32 %v399_v11, %v347_v61  ;;  %v739_v61 = vmul.f32 %v737_v47, %v1659_v46 }
 0x13b   : > { %v495_v13 = vpop.permute.xlu2 %494 }
 0x13e   : > { %v423_v14 = vpop.permute.xlu1 %422 }
 0x13f   : > { %v426_v15 = vsel %vm227_vm4, %v423_v14, %v425_v0 }
 0x140   : > { %v428_v17 = vadd.f32 %v426_v15, %v374_v6 }
 0x143   : > { %v522_v18 = vpop.permute.xlu2 %521 }
 0x146   : > { %v450_v19 = vpop.permute.xlu1 %449 }
 0x147   : > { %v453_v20 = vsel %vm245_vm5, %v450_v19, %v452_v8 }
 0x148   : > { %v455_v22 = vadd.f32 %v453_v20, %v428_v17 }
 0x14a   : > { %v471_v38 = vadd.f32 %v469_v35, %v455_v22 }
 0x14b   : > { %v551_v23 = vpop.permute.xlu2 %550 }
 0x14e   : > { %v493_v26 = vpop.permute.xlu1 %492 }
 0x14f   : > { %v496_v27 = vsel %vm191_vm3, %v493_v26, %v495_v13  ;;  %v1703_v26 = vld [vmem:[%s1408_s9 + $0x8] sm:$0xf0] }
 0x150   : > { %v498_v30 = vadd.f32 %v496_v27, %v401_v12  ;;  %v1706_v27 = vld [vmem:[%s1408_s9 + $0x18] sm:$0xf] }
 0x153   : > { %v578_v36 = vpop.permute.xlu2 %577 }
 0x154   : > { %v872_v15 = vpop.permute.xlu0 %871 }
 0x155   : > { %v875_v20 = vmul.f32 %v872_v15, %v1669_v57  ;;  %v877_v21 = vmul.f32 %v872_v15, %v1672_v58 }
 0x156   : > { %v520_v37 = vpop.permute.xlu1 %519 }
 0x157   : > { %v523_v39 = vsel %vm191_vm3, %v520_v37, %v522_v18  ;;  %v885_v24 = vrot.slane %v875_v20, 3  ;;  %v886_v25 = vrot.slane %v877_v21, 3 }
 0x158   : > { %v525_v40 = vadd.f32 %v523_v39, %v471_v38 }
 0x15b   : > { %v605_v41 = vpop.permute.xlu2 %604 }
 0x15e   : > { %v549_v42 = vpop.permute.xlu1 %548 }
 0x15f   : > { %v1655_v43 = vsel %vm209_vm2, %v549_v42, %v551_v23 }
 0x166   : > { %v576_v44 = vpop.permute.xlu1 %575  ;;  %v632_v45 = vpop.permute.xlu2 %631 }
 0x167   : > { %v579_v31 = vsel %vm209_vm2, %v576_v44, %v578_v36 }
 0x168   : > { %v581_v33 = vadd.f32 %v579_v31, %v498_v30  ;;  %v887_v30 = vsel %vm700_vm6, %v885_v24, %v886_v25  ;;  %v874_v31 = vmul.f32 %v872_v15, %v1659_v46 }
 0x16e   : > { %v603_v48 = vpop.permute.xlu1 %602  ;;  %v667_v49 = vpop.permute.xlu2 %666 }
 0x16f   : > { %v606_v51 = vsel %vm209_vm2, %v603_v48, %v605_v41  ;;  %v669_v52 = vmul.f32 %v667_v49, %v1501_v53  ;;  %v670_v56 = vmul.f32 %v667_v49, %v1505_v54  ;;  %v671_v34 = vmul.f32 %v667_v49, %v1508_v55 }
 0x170   : > { %v608_v59 = vadd.f32 %v606_v51, %v525_v40  ;;  %v672_v60 = vmul.f32 %v667_v49, %v1511_v32  ;;  %v740_v53 = vmul.f32 %v737_v47, %v1669_v57  ;;  %v742_v54 = vmul.f32 %v737_v47, %v1672_v58 }
 0x171   : > { %v677_v62 = vrot.slane %v669_v52, 2  ;;  %v678_v63 = vrot.slane %v671_v34, 2  ;;  %v680_v0 = vrot.slane %v670_v56, 2  ;;  %v747_v32 = vrot.slane %v739_v61, 3  ;;  %v1724_v56 = vld [vmem:[%s1408_s9] sm:$0xf0] }
 0x172   : > { %v681_v2 = vrot.slane %v672_v60, 2  ;;  %v750_v5 = vrot.slane %v740_v53, 3  ;;  %v751_v6 = vrot.slane %v742_v54, 3  ;;  %v882_v51 = vrot.slane %v874_v31, 3  ;;  %v1727_v34 = vld [vmem:[%s1408_s9 + $0x10] sm:$0xf] }
 0x173   : > { %v679_v55 = vsel %vm466_vm1, %v677_v62, %v678_v63  ;;  %v749_v7 = vsel %vm700_vm6, %v747_v32, %v748_v16  ;;  %s1220_s9 = scalar_lea.hbm %s1862_s3, 32 }
 0x174   : > { %683 = vrot.lane.b32.xlu0 %v679_v55, %s1271_s26  ;;  %v682_v3 = vsel %vm466_vm1, %v680_v0, %v681_v2  ;;  %v752_v10 = vsel %vm700_vm6, %v750_v5, %v751_v6  ;;  %p1222_p1 = scmp.lt.s32.totalorder %s1220_s9, %s1216_s28 }
 0x175   : > { %685 = vrot.lane.b32.xlu1 %v682_v3, %s1271_s26 }
 0x176   : > { %v1683_v4 = vpop.permute.xlu2 %844  ;;  %p1223_p2 = por %p1222_p1, %p1221_p0 }
 0x177   : > { %v847_v8 = vmul.f32 %v1683_v4, %v1659_v46  ;;  %v849_v9 = vmul.f32 %v1683_v4, %v1662_v50 }
 0x178   : > { %p1224_p3 = pnand %p1223_p2, %p1219_p13 }
 0x179   : > { %v855_v13 = vrot.slane %v847_v8, 3  ;;  %v856_v14 = vrot.slane %v849_v9, 3  ;;  %v764_v8 = vpop.permute.xlu0 %763 }
 0x17b   : > { %v857_v19 = vsel %vm700_vm6, %v855_v13, %v856_v14  ;;  %v767_v14 = vmul.f32 %v764_v8, %v1669_v57 }
 0x17c   : > { %753 = vrot.lane.b32.xlu0 %v749_v7, %s1269_s11 }
 0x17d   : > { %755 = vrot.lane.b32.xlu1 %v752_v10, %s1269_s11  ;;  %v777_v25 = vrot.slane %v767_v14, 3 }
 0x17e   : > { %v915_v11 = vpop.permute.xlu2 %914  ;;  %v630_v12 = vpop.permute.xlu1 %629 }
 0x17f   : > { %v633_v17 = vsel %vm227_vm4, %v630_v12, %v632_v45  ;;  %v918_v28 = vmul.f32 %v915_v11, %v1703_v26  ;;  %v920_v29 = vmul.f32 %v915_v11, %v1706_v27  ;;  %v917_v63 = vmul.f32 %v915_v11, %v1724_v56 }
 0x180   : > { %v1694_v18 = vadd.f32 %v633_v17, %v581_v33  ;;  %v876_v33 = vmul.f32 %v872_v15, %v1662_v50  ;;  %v919_v0 = vmul.f32 %v915_v11, %v1727_v34  ;;  %v769_v15 = vmul.f32 %v764_v8, %v1672_v58 }
 0x181   : > { %v928_v37 = vrot.slane %v918_v28, 4  ;;  %v929_v38 = vrot.slane %v920_v29, 4  ;;  %v925_v55 = vrot.slane %v917_v63, 4  ;;  %v848_v17 = vmul.f32 %v1683_v4, %v1669_v57 }
 0x182   : > { %v883_v52 = vrot.slane %v876_v33, 3  ;;  %v926_v3 = vrot.slane %v919_v0, 4  ;;  %v778_v28 = vrot.slane %v769_v15, 3 }
 0x183   : > { %v930_v47 = vsel %vm905_vm7, %v928_v37, %v929_v38 }
 0x184   : > { %v884_v1 = vsel %vm700_vm6, %v882_v51, %v883_v52  ;;  %v927_v13 = vsel %vm905_vm7, %v925_v55, %v926_v3  ;;  %v969_v52 = vpop.permute.xlu0 %968 }
 0x185   : > { %861 = vrot.lane.b32.xlu1 %v857_v19, %s1270_s20  ;;  %v850_v19 = vmul.f32 %v1683_v4, %v1672_v58 }
 0x186   : > { %v1700_v22 = vpop.permute.xlu2 %817  ;;  %v657_v23 = vpop.permute.xlu1 %656 }
 0x187   : > { %v821_v9 = vmul.f32 %v1700_v22, %v1669_v57  ;;  %v823_v10 = vmul.f32 %v1700_v22, %v1672_v58  ;;  %v820_v38 = vmul.f32 %v1700_v22, %v1659_v46 }
 0x189   : > { %v832_v24 = vrot.slane %v823_v10, 3 }
 0x18d   : > { %890 = vrot.lane.b32.xlu1 %v887_v30, %s1271_s26  ;;  %v858_v30 = vrot.slane %v848_v17, 3 }
 0x18e   : > { %v659_v35 = vpop.permute.xlu2 %658  ;;  %v791_v36 = vpop.permute.xlu1 %790 }
 0x18f   : > { %v660_v39 = vsel %vm227_vm4, %v657_v23, %v659_v35  ;;  %v794_v40 = vmul.f32 %v791_v36, %v1669_v57  ;;  %v796_v42 = vmul.f32 %v791_v36, %v1672_v58  ;;  %v793_v2 = vmul.f32 %v791_v36, %v1659_v46 }
 0x190   : > { %v1714_v41 = vadd.f32 %v660_v39, %v608_v59  ;;  %v795_v53 = vmul.f32 %v791_v36, %v1662_v50  ;;  %v831_v23 = vrot.slane %v821_v9, 3  ;;  %v859_v35 = vrot.slane %v850_v19, 3 }
 0x191   : > { %v804_v44 = vrot.slane %v794_v40, 3  ;;  %v805_v45 = vrot.slane %v796_v42, 3  ;;  %v801_v16 = vrot.slane %v793_v2, 3  ;;  %v822_v39 = vmul.f32 %v1700_v22, %v1662_v50 }
 0x192   : > { %v802_v5 = vrot.slane %v795_v53, 3  ;;  %v833_v36 = vsel %vm700_vm6, %v831_v23, %v832_v24  ;;  %v779_v40 = vsel %vm700_vm6, %v777_v25, %v778_v28 }
 0x193   : > { %v806_v48 = vsel %vm700_vm6, %v804_v44, %v805_v45  ;;  %v860_v45 = vsel %vm700_vm6, %v858_v30, %v859_v35 }
 0x194   : > { %809 = vrot.lane.b32.xlu0 %v806_v48, %s1268_s10  ;;  %v803_v20 = vsel %vm700_vm6, %v801_v16, %v802_v5  ;;  %v829_v48 = vrot.slane %v822_v39, 3 }
 0x195   : > { %933 = vrot.lane.b32.xlu1 %v930_v47, %s1269_s11  ;;  %v828_v47 = vrot.slane %v820_v38, 3 }
 0x196   : > { %v710_v49 = vpop.permute.xlu1 %709 }
 0x197   : > { %v712_v59 = vmul.f32 %v710_v49, %v1659_v46  ;;  %v714_v60 = vmul.f32 %v710_v49, %v1662_v50  ;;  %v713_v42 = vmul.f32 %v710_v49, %v1669_v57  ;;  %v715_v44 = vmul.f32 %v710_v49, %v1672_v58 }
 0x198   : > { %v830_v57 = vsel %vm700_vm6, %v828_v47, %v829_v48  ;;  %v972_v58 = vmul.f32 %v969_v52, %v1703_v26  ;;  %v974_v49 = vmul.f32 %v969_v52, %v1706_v27  ;;  %v1199_v47 = vld [vmem:[%s1860_s1 + $0x1e] ss:$0 sm:$0xff] }
 0x199   : > { %v720_v61 = vrot.slane %v712_v59, 3  ;;  %v721_v62 = vrot.slane %v714_v60, 3  ;;  %v723_v51 = vrot.slane %v713_v42, 3  ;;  %v724_v22 = vrot.slane %v715_v44, 3 }
 0x19a   : > { %v766_v60 = vmul.f32 %v764_v8, %v1659_v46  ;;  %v982_v63 = vrot.slane %v972_v58, 4  ;;  %v983_v0 = vrot.slane %v974_v49, 4 }
 0x19b   : > { %v722_v54 = vsel %vm700_vm6, %v720_v61, %v721_v62  ;;  %v768_v61 = vmul.f32 %v764_v8, %v1662_v50  ;;  %v725_v62 = vsel %vm700_vm6, %v723_v51, %v724_v22 }
 0x19c   : > { %726 = vrot.lane.b32.xlu2 %v722_v54, %s1269_s11  ;;  %888 = vrot.lane.b32.xlu0 %v884_v1, %s1271_s26  ;;  %v774_v1 = vrot.slane %v766_v60, 3  ;;  %v984_v53 = vsel %vm905_vm7, %v982_v63, %v983_v0 }
 0x19d   : > { %v775_v2 = vrot.slane %v768_v61, 3 }
 0x19e   : > { %v942_v32 = vpop.permute.xlu1 %941 }
 0x19f   : > { %v944_v6 = vmul.f32 %v942_v32, %v1724_v56  ;;  %v946_v7 = vmul.f32 %v942_v32, %v1727_v34  ;;  %v945_v54 = vmul.f32 %v942_v32, %v1703_v26  ;;  %v947_v55 = vmul.f32 %v942_v32, %v1706_v27 }
 0x1a0   : > { %v776_v3 = vsel %vm700_vm6, %v774_v1, %v775_v2 }
 0x1a1   : > { %v952_v11 = vrot.slane %v944_v6, 4  ;;  %v953_v12 = vrot.slane %v946_v7, 4  ;;  %v955_v16 = vrot.slane %v945_v54, 4  ;;  %v956_v5 = vrot.slane %v947_v55, 4 }
 0x1a2   : > { %v971_v6 = vmul.f32 %v969_v52, %v1724_v56  ;;  %v973_v7 = vmul.f32 %v969_v52, %v1727_v34  ;;  %v901_v52 = vmul.f32 %v1199_v47, %v1724_v56 }
 0x1a3   : > { %v954_v21 = vsel %vm905_vm7, %v952_v11, %v953_v12  ;;  %v957_v8 = vsel %vm905_vm7, %v955_v16, %v956_v5 }
 0x1a4   : > { %807 = vrot.lane.b32.xlu2 %v803_v20, %s1268_s10  ;;  %958 = vrot.lane.b32.xlu1 %v954_v21, %s1268_s10  ;;  %v979_v9 = vrot.slane %v971_v6, 4  ;;  %v980_v10 = vrot.slane %v973_v7, 4  ;;  %v906_v60 = vrot.slane %v901_v52, 4 }
 0x1a5   : > { %931 = vrot.lane.b32.xlu0 %v927_v13, %s1269_s11 }
 0x1a6   : > { %v996_v29 = vpop.permute.xlu1 %995  ;;  %v981_v12 = vsel %vm905_vm7, %v979_v9, %v980_v10 }
 0x1a7   : > { %v998_v4 = vmul.f32 %v996_v29, %v1724_v56  ;;  %v1000_v37 = vmul.f32 %v996_v29, %v1727_v34  ;;  %v999_v32 = vmul.f32 %v996_v29, %v1703_v26  ;;  %v1001_v11 = vmul.f32 %v996_v29, %v1706_v27  ;;  %v1198_v29 = vld [vmem:[%s1860_s1 + $0x19] ss:$0 sm:$0xff] }
 0x1a9   : > { %v1006_v31 = vrot.slane %v998_v4, 4  ;;  %v1007_v33 = vrot.slane %v1000_v37, 4  ;;  %v1009_v13 = vrot.slane %v999_v32, 4  ;;  %v1010_v14 = vrot.slane %v1001_v11, 4 }
 0x1aa   : > { %v696_v4 = vmul.f32 %v1198_v29, %v1659_v46  ;;  %v697_v37 = vmul.f32 %v1198_v29, %v1662_v50 }
 0x1ab   : > { %v1008_v59 = vsel %vm905_vm7, %v1006_v31, %v1007_v33  ;;  %v1011_v15 = vsel %vm905_vm7, %v1009_v13, %v1010_v14 }
 0x1ac   : > { %863 = vrot.lane.b32.xlu2 %v860_v45, %s1270_s20  ;;  %836 = vrot.lane.b32.xlu1 %v833_v36, %s1270_s20  ;;  %v701_v39 = vrot.slane %v696_v4, 3 }
 0x1ad   : > { %782 = vrot.lane.b32.xlu0 %v779_v40, %s1268_s10  ;;  %v702_v40 = vrot.slane %v697_v37, 3 }
 0x1af   : > { %v703_v31 = vsel %vm700_vm6, %v701_v39, %v702_v40 }
 0x1b4   : > { %728 = vrot.lane.b32.xlu2 %v725_v62, %s1269_s11  ;;  %1012 = vrot.lane.b32.xlu1 %v1008_v59, %s1271_s26 }
 0x1b5   : > { %834 = vrot.lane.b32.xlu0 %v830_v57, %s1270_s20  ;;  %v902_v57 = vmul.f32 %v1199_v47, %v1727_v34 }
 0x1b7   : > { %v907_v63 = vrot.slane %v902_v57, 4 }
 0x1b9   : > { %v908_v16 = vsel %vm905_vm7, %v906_v60, %v907_v63 }
 0x1bc   : > { %780 = vrot.lane.b32.xlu2 %v776_v3, %s1268_s10 }
 0x1bd   : > { %987 = vrot.lane.b32.xlu0 %v984_v53, %s1270_s20 }
 0x1c4   : > { %960 = vrot.lane.b32.xlu2 %v957_v8, %s1268_s10 }
 0x1cc   : > { %985 = vrot.lane.b32.xlu2 %v981_v12, %s1270_s20 }
 0x1d4   : > { %1014 = vrot.lane.b32.xlu2 %v1011_v15, %s1271_s26 }
 0x1e6   : > { %v684_v20 = vpop.permute.xlu0 %683 }
 0x1e7   : > { %v686_v17 = vpop.permute.xlu1 %685 }
 0x1e8   : > { %v687_v38 = vsel %vm245_vm5, %v684_v20, %v686_v17 }
 0x1e9   : > { %v689_v45 = vadd.f32 %v687_v38, %v1714_v41  ;;  %v1197_v41 = vld [vmem:[%s1861_s2] ss:$0 sm:$0xff] }
 0x1ea   : > { %v554_v56 = vadd.f32 %v1197_v41, %v1655_v43 }
 0x1eb   : > { %v705_v46 = vadd.f32 %v703_v31, %v689_v45 }
 0x1ec   : > { %v1019_v6 = vmax.f32 %v554_v56, 0.0 }
 0x1ee   : > { %v754_v25 = vpop.permute.xlu0 %753 }
 0x1ef   : > { %v756_v19 = vpop.permute.xlu1 %755 }
 0x1f0   : > { %v757_v48 = vsel %vm191_vm3, %v754_v25, %v756_v19 }
 0x1f1   : > { %v759_v22 = vadd.f32 %v757_v48, %v705_v46 }
 0x1f6   : > { %v727_v21 = vpop.permute.xlu2 %726 }
 0x1f7   : > { %v862_v23 = vpop.permute.xlu1 %861 }
 0x1fe   : > { %v808_v24 = vpop.permute.xlu2 %807 }
 0x1ff   : > { %v891_v28 = vpop.permute.xlu1 %890 }
 0x206   : > { %v864_v26 = vpop.permute.xlu2 %863  ;;  %v810_v27 = vpop.permute.xlu0 %809 }
 0x207   : > { %v934_v36 = vpop.permute.xlu1 %933  ;;  %v811_v50 = vsel %vm209_vm2, %v808_v24, %v810_v27  ;;  %v865_v61 = vsel %vm227_vm4, %v862_v23, %v864_v26 }
 0x208   : > { %v813_v58 = vadd.f32 %v811_v50, %v759_v22 }
 0x20a   : > { %v867_v2 = vadd.f32 %v865_v61, %v813_v58 }
 0x20e   : > { %v729_v30 = vpop.permute.xlu2 %728  ;;  %v889_v35 = vpop.permute.xlu0 %888 }
 0x20f   : > { %v730_v49 = vsel %vm191_vm3, %v727_v21, %v729_v30  ;;  %v892_v62 = vsel %vm245_vm5, %v889_v35, %v891_v28 }
 0x210   : > { %v732_v34 = vadd.f32 %v730_v49, %v1694_v18  ;;  %v894_v54 = vadd.f32 %v892_v62, %v867_v2  ;;  %v1020_v18 = vmin.f32 %v1019_v6, 6.0 }
 0x212   : > { %v910_v9 = vadd.f32 %v908_v16, %v894_v54 }
 0x216   : > { %v781_v42 = vpop.permute.xlu2 %780  ;;  %v959_v33 = vpop.permute.xlu1 %958 }
 0x217   : > { %v932_v44 = vpop.permute.xlu0 %931 }
 0x218   : > { %v935_v8 = vsel %vm191_vm3, %v932_v44, %v934_v36 }
 0x219   : > { %v937_v32 = vadd.f32 %v935_v8, %v910_v9 }
 0x21e   : > { %v961_v51 = vpop.permute.xlu2 %960  ;;  %v837_v1 = vpop.permute.xlu1 %836 }
 0x21f   : > { %v783_v59 = vpop.permute.xlu0 %782  ;;  %v962_v43 = vsel %vm209_vm2, %v959_v33, %v961_v51 }
 0x220   : > { %v784_v0 = vsel %vm209_vm2, %v781_v42, %v783_v59  ;;  %v964_v13 = vadd.f32 %v962_v43, %v937_v32 }
 0x221   : > { %v786_v55 = vadd.f32 %v784_v0, %v732_v34 }
 0x226   : > { %v986_v53 = vpop.permute.xlu2 %985  ;;  %v1013_v12 = vpop.permute.xlu1 %1012 }
 0x227   : > { %v835_v3 = vpop.permute.xlu0 %834 }
 0x228   : > { %v838_v5 = vsel %vm227_vm4, %v835_v3, %v837_v1 }
 0x229   : > { %v840_v7 = vadd.f32 %v838_v5, %v786_v55 }
 0x22b   : > { %v1021_v10 = vmax.f32 %v840_v7, 0.0 }
 0x22d   : > { %v1022_v11 = vmin.f32 %v1021_v10, 6.0 }
 0x22e   : > { %v1015_v15 = vpop.permute.xlu2 %1014 }
 0x22f   : > { %v1023_v14 = vmul.f32 %v1022_v11, %v1020_v18  ;;  %v988_v17 = vpop.permute.xlu0 %987  ;;  %v1016_v21 = vsel %vm245_vm5, %v1013_v12, %v1015_v15 }
 0x230   : > { %v989_v19 = vsel %vm227_vm4, %v986_v53, %v988_v17 }
 0x231   : > { %v991_v20 = vadd.f32 %v989_v19, %v964_v13 }
 0x233   : > { %v1018_v23 = vadd.f32 %v1016_v21, %v991_v20 }
 0x235   : > { %v1024_v24 = vmax.f32 %v1018_v23, 0.0 }
 0x237   : > { %v1025_v25 = vmin.f32 %v1024_v24, 6.0 }
 0x239   : > { %v1026_v26 = vmul.f32 %v1025_v25, %v1023_v14 }
 0x23b   : > { %1027 = vst [vmem:[%s163_s30] sm:$0xff] %v1026_v26 }
 0x23c   : > { %1227 = shalt.err (!%p1224_p3)
}
 0x23d   : > { %1115 = dma.vmem_to_hbm [thread:$0]  (%p1330_p5), %s1042_s4, 128, %s1044_s29, %s1029_s6  }
 0x23e PF: > { %p1121_p4 = scmp.ge.s32.totalorder %s1262_s15, 2  ;;  %s1055_s20 = sand.u32 1, %s1250_s12  }
 0x23f   : > { %s1056_s26 = scalar_lea.sflag [#allocation3], %s1055_s20 }
 0x240   : > { %p1118_p7 = pnand %p1121_p4, %p1334_p6 }
 0x242   : > { %p1119_p8 = pneg %p1118_p7 }
 0x244   : > { %1245 = dma.done.wait (%p1119_p8), %s1056_s26, 128  }
 0x245   : > { %1247 = vsyncadd (%p1119_p8), %s1056_s26, 4294967168  ;;  %p13_p9 = scmp.ge.s32.totalorder %s1317_s18, 6   ;;  %s1865_s12 = smov %s1254_s13 }
 0x246   : > { %s1866_s13 = smov %s1258_s14  ;;  %s1867_s14 = smov %s1328_s21 }
 0x247   : > { %s1868_s15 = smov %s1317_s18  ;;  %15 = sbr.rel (!%p13_p9) target bundleno = 3 (0x3), region = 67 }
 0x24c   :  { %1062 = vsyncpa [#allocation3], 1 }
 0x24d   :  { %1064 = vsyncpa [#allocation3 + $0x1], 1 }

</bundles_post_ra>
